<compile_context>
chip_gen: v5e
topology: v5e:2x2
jax: 0.10.0
libtpu: 0.0.40
codegen_flags: <defaults>
</compile_context>

<pallas_src>
import functools

import jax
import jax.numpy as jnp
import numpy as np
from jax.experimental import pallas as pl
from jax.experimental.pallas import tpu as pltpu


def _round_up(x, m):
    return ((x + m - 1) // m) * m


def _disc_loss_kernel(feat_ref, lab_ref, out_ref, mean_ref, cnt_ref, var_ref, *,
                      n_total, feat_dim, num_clusters, delta_dist, alpha, beta,
                      gamma, mask_tail):
    phase = pl.program_id(0)          # 0: accumulate sums/counts, 1: hinge + final
    tile = pl.program_id(1)
    n_tiles = pl.num_programs(1)
    D = feat_dim
    C = num_clusters
    TN = feat_ref.shape[0]            # static tile height

    labels = lab_ref[...]             # (1, TN) int32, lane-dense
    cluster_ids = jax.lax.broadcasted_iota(jnp.int32, (C, TN), 0)
    onehot_bool = labels == cluster_ids            # (C, TN)

    feats = feat_ref[...].astype(jnp.float32)      # (TN, D); bf16 upcast per tile

    if mask_tail:
        # Ragged last tile: rows past n_total hold stale VMEM garbage (possibly
        # NaN/Inf) -> zero them out of both the membership and the features so
        # neither the MXU contraction nor the hinge ever touches them.
        lane_pos = jax.lax.broadcasted_iota(jnp.int32, (C, TN), 1) + tile * TN
        onehot_bool = jnp.logical_and(onehot_bool, lane_pos < n_total)
        row_pos = jax.lax.broadcasted_iota(jnp.int32, (TN, 1), 0) + tile * TN
        feats = jnp.where(row_pos < n_total, feats, 0.0)

    onehot_t = onehot_bool.astype(jnp.float32)     # (C, TN), lane-major over points

    # ---------------- phase 0: per-cluster sums & counts ---------------------
    @pl.when(phase == 0)
    def _():
        @pl.when(tile == 0)
        def _():
            mean_ref[...] = jnp.zeros_like(mean_ref)
            cnt_ref[...] = jnp.zeros_like(cnt_ref)

        # MXU: per-cluster feature sums.  Counts are a lane reduce of the same
        # one-hot (XLU slot) — no ones-column / wrapper concatenate required.
        mean_ref[...] += jnp.dot(onehot_t, feats,
                                 preferred_element_type=jnp.float32)
        cnt_ref[...] += jnp.sum(onehot_t, axis=1, keepdims=True)

        # Last tile: convert [sums, counts] -> [means, 1/n_c] in place.
        @pl.when(tile == n_tiles - 1)
        def _():
            counts = cnt_ref[...]                           # (C, 1)
            present = (counts > 0.5).astype(jnp.float32)
            inv = present / jnp.maximum(counts, 1.0)        # 0 for empty clusters
            mean_ref[...] = mean_ref[...] * inv             # broadcast over D
            cnt_ref[...] = inv

    # ---------------- phase 1: variance term + finalize ----------------------
    @pl.when(phase == 1)
    def _():
        @pl.when(tile == 0)
        def _():
            var_ref[...] = jnp.zeros_like(var_ref)

        # Per-point cluster mean and 1/n_{c(i)} via membership contractions
        # (K = C is tiny; MXU efficiency is irrelevant at this intensity).
        mu_pt = jax.lax.dot_general(onehot_t, mean_ref[...],
                                    (((0,), (0,)), ((), ())),
                                    preferred_element_type=jnp.float32)   # (TN, D)
        w_pt = jax.lax.dot_general(onehot_t, cnt_ref[...],
                                   (((0,), (0,)), ((), ())),
                                   preferred_element_type=jnp.float32)    # (TN, 1)
        diff = feats - mu_pt
        dist = jnp.sqrt(jnp.sum(diff * diff, axis=1, keepdims=True))      # (TN, 1)
        hinge = jnp.maximum(dist - 1.0, 0.0)
        # sum_i hsq_i / n_{c(i)}  ==  sum_c mean_{i in c} hsq_i.
        # Masked/OOB rows have feats == 0 and onehot row == 0 -> hinge == 0,
        # w_pt == 0, so they contribute exactly nothing.
        var_ref[...] += jnp.sum(hinge * hinge * w_pt, keepdims=True)      # (1, 1)

        @pl.when(tile == n_tiles - 1)
        def _():
            means = mean_ref[...]                         # (C, D); 0 if empty
            inv = cnt_ref[...]                            # (C, 1)
            pres_col = (inv > 0.0).astype(jnp.float32)    # (C, 1)
            n_pres = jnp.sum(pres_col, keepdims=True)     # (1, 1) present clusters
            n_pres_safe = jnp.maximum(n_pres, 1.0)

            # Pairwise cluster distances via the Gram matrix (no (C,C,D) blob).
            gram = jax.lax.dot_general(means, means,
                                       (((1,), (1,)), ((), ())),
                                       preferred_element_type=jnp.float32)  # (C, C)
            ii = jax.lax.broadcasted_iota(jnp.int32, (C, C), 0)
            jj = jax.lax.broadcasted_iota(jnp.int32, (C, C), 1)
            eye = (ii == jj).astype(jnp.float32)
            sqn_col = jnp.sum(gram * eye, axis=1, keepdims=True)       # (C, 1)
            sqn_row = jnp.sum(gram * eye, axis=0, keepdims=True)       # (1, C)
            pres_row = jnp.sum(eye * pres_col, axis=0, keepdims=True)  # (1, C)

            pd2 = jnp.maximum(sqn_col + sqn_row - 2.0 * gram, 0.0)
            pd = jnp.sqrt(pd2)
            pair_mask = pres_col * pres_row * (1.0 - eye)
            dh = jnp.maximum(2.0 * delta_dist - pd, 0.0) * pair_mask
            dist_sum = jnp.sum(dh * dh, keepdims=True)                 # (1, 1)
            n_pairs = n_pres * (n_pres - 1.0)
            dist_loss = jnp.where(n_pairs > 0.5,
                                  dist_sum / jnp.maximum(n_pairs, 1.0), 0.0)

            # Regularizer reuses the Gram diagonal (||mu_c||^2).
            reg = jnp.sum(jnp.sqrt(sqn_col), keepdims=True) / n_pres_safe
            var_loss = var_ref[...] / n_pres_safe

            out_ref[...] = alpha * var_loss + beta * dist_loss + gamma * reg


def _pick_tile_n():
    """Per-generation tile default: bigger tiles amortize the ~0.35us/step cost.

    v5e/v6e (128 MiB VMEM) comfortably take 16384 rows/tile; v7x (64 MiB per
    TensorCore) is capped at 8192 given the D->128 lane padding.  Falls back to
    the conservative 8192 if the hardware query is unavailable.
    """
    try:
        vmem = pltpu.get_tpu_info().vmem_capacity_bytes
    except Exception:
        return 8192
    return 16384 if vmem >= (100 << 20) else 8192


def discriminative_loss(features, labels, *, num_clusters, delta_var=0.5,
                        delta_dist=1.5, norm=2, alpha=1.0, beta=1.0,
                        gamma=0.001, tile_n=None):
    """Pallas implementation of DiscriminativeLoss.forward (multiclass=False).

    `delta_var` and `norm` are accepted for interface parity: the reference
    hard-codes the variance margin to 1 and only the L2 norm is implemented.
    Real labels must lie in [0, num_clusters).
    """
    del delta_var, norm
    N, D = features.shape
    C = int(num_clusters)

    # No wrapper-side concatenate / pad / transpose: each would be an extra full
    # HBM pass on an HBM-bound kernel.  f32/bf16 features stream as-is (bf16 is
    # upcast per tile inside the kernel); anything else is cast to f32 once.
    if features.dtype not in (jnp.float32, jnp.bfloat16):
        features = features.astype(jnp.float32)
    # Lane-dense labels: (1, N) int32 (tiny, a few % of the feature bytes).
    labels_row = jnp.asarray(labels).reshape(1, -1).astype(jnp.int32)

    if tile_n is None:
        tile_n = _pick_tile_n()
    tile_n = int(tile_n)
    if N <= tile_n:
        tn = N                                    # single full-extent tile
    else:
        tn = max(128, (tile_n // 128) * 128)      # lane-aligned label tiles
    n_tiles = -(-N // tn)                         # cdiv: ragged tail masked in-kernel
    mask_tail = (N % tn) != 0

    kernel = functools.partial(
        _disc_loss_kernel,
        n_total=N, feat_dim=D, num_clusters=C, delta_dist=float(delta_dist),
        alpha=float(alpha), beta=float(beta), gamma=float(gamma),
        mask_tail=mask_tail)

    # VMEM budget: a feature tile pads its last dim to a multiple of 128 lanes;
    # allow double-buffered inputs plus phase-1 intermediates (mu, diff, ...).
    row_bytes = _round_up(D, 128) * 4
    tile_bytes = _round_up(tn, 8) * row_bytes
    vmem_limit = int(min(max(10 * tile_bytes + (4 << 20), 32 << 20), 96 << 20))

    out = pl.pallas_call(
        kernel,
        out_shape=jax.ShapeDtypeStruct((1, 1), jnp.float32),
        grid=(2, n_tiles),                                   # (phase, N-tile)
        in_specs=[
            pl.BlockSpec((tn, D), lambda p, t: (t, 0)),      # features
            pl.BlockSpec((1, tn), lambda p, t: (0, t)),      # labels, lane-dense
        ],
        out_specs=pl.BlockSpec((1, 1), lambda p, t: (0, 0)),
        scratch_shapes=[
            pltpu.VMEM((C, D), jnp.float32),   # per-cluster sums -> means
            pltpu.VMEM((C, 1), jnp.float32),   # per-cluster counts -> 1/n_c
            pltpu.VMEM((1, 1), jnp.float32),   # variance-term accumulator
        ],
        compiler_params=pltpu.CompilerParams(
            dimension_semantics=("arbitrary", "arbitrary"),
            vmem_limit_bytes=vmem_limit),
    )(features, labels_row)
    return out[0, 0]


def _reference_loss(feats, labels, *, delta_dist=1.5, alpha=1.0, beta=1.0,
                    gamma=0.001):
    """NumPy port of the PyTorch module for verification."""
    feats = np.asarray(feats, np.float32)
    labels = np.asarray(labels).reshape(-1)
    clusters = np.unique(labels)
    C = len(clusters)
    means = np.stack([feats[labels == c].mean(0) for c in clusters])

    var_loss = 0.0
    for i, c in enumerate(clusters):
        d = np.linalg.norm(feats[labels == c] - means[i], axis=1)
        var_loss += np.mean(np.maximum(d - 1.0, 0.0) ** 2)
    var_loss /= C

    dist_loss = 0.0
    if C >= 2:
        for i in range(C):
            for j in range(C):
                if i != j:
                    d = np.linalg.norm(means[i] - means[j])
                    dist_loss += np.maximum(2.0 * delta_dist - d, 0.0) ** 2
        dist_loss /= (C - 1) * C

    reg = np.mean(np.linalg.norm(means, axis=1))
    return alpha * var_loss + beta * dist_loss + gamma * reg


if __name__ == "__main__":
    key = jax.random.PRNGKey(0)
    k_feat, k_perm, k_feat2 = jax.random.split(key, 3)

    # Case 1: single full-extent tile, all clusters populated.
    N, D, C = 256, 32, 4
    x = jax.random.normal(k_feat, (N, D), dtype=jnp.float32)
    y = jax.random.permutation(k_perm, jnp.arange(N, dtype=jnp.int32) % C)
    y = y.reshape(N, 1)
    loss = jax.block_until_ready(discriminative_loss(x, y, num_clusters=C))
    ref = _reference_loss(np.asarray(x), np.asarray(y))
    assert np.isfinite(float(loss))
    np.testing.assert_allclose(float(loss), float(ref), rtol=1e-4, atol=1e-4)

    # Case 2: multi-tile with a ragged last tile (exercises in-kernel masking
    # that replaced the wrapper pad).
    N2, C2 = 200, 3
    x2 = jax.random.normal(k_feat2, (N2, D), dtype=jnp.float32)
    y2 = (jnp.arange(N2, dtype=jnp.int32) % C2).reshape(N2, 1)
    loss2 = jax.block_until_ready(
        discriminative_loss(x2, y2, num_clusters=C2, tile_n=128))
    ref2 = _reference_loss(np.asarray(x2), np.asarray(y2))
    np.testing.assert_allclose(float(loss2), float(ref2), rtol=1e-4, atol=1e-4)

    print("KERNEL_OK")
</pallas_src>

<mosaic_0001>
module attributes {stable_mosaic.version = 11 : i64} {
  func.func @_disc_loss_kernel(%arg0: i32, %arg1: i32, %arg2: memref<256x32xf32, #tpu.memory_space<vmem>>, %arg3: memref<1x256xi32, #tpu.memory_space<vmem>>, %arg4: memref<1x1xf32, #tpu.memory_space<vmem>>, %arg5: memref<4x32xf32, #tpu.memory_space<vmem>>, %arg6: memref<4x1xf32, #tpu.memory_space<vmem>>, %arg7: memref<1x1xf32, #tpu.memory_space<vmem>>) attributes {dimension_semantics = [#tpu.dimension_semantics<arbitrary>, #tpu.dimension_semantics<arbitrary>], iteration_bounds = array<i64: 2, 1>, scalar_prefetch = 0 : i64, scratch_operands = 3 : i64, tpu.core_type = #tpu.core_type<tc>, window_params = [{transform_indices = @transform_0, window_bounds = array<i64: 256, 32>}, {transform_indices = @transform_1, window_bounds = array<i64: 1, 256>}, {pipeline_mode = #tpu.pipeline_mode<synchronous>, transform_indices = @transform_2, window_bounds = array<i64: 1, 1>}]} {
    %c0 = arith.constant 0 : index
    %c0_0 = arith.constant 0 : index
    %0 = vector.load %arg3[%c0, %c0_0] : memref<1x256xi32, #tpu.memory_space<vmem>>, vector<1x256xi32>
    %1 = tpu.iota {dimensions = array<i32: 0>} : vector<4x256xi32>
    %2 = vector.broadcast %0 : vector<1x256xi32> to vector<4x256xi32>
    %3 = arith.cmpi eq, %2, %1 : vector<4x256xi32>
    %c0_1 = arith.constant 0 : index
    %c0_2 = arith.constant 0 : index
    %4 = vector.load %arg2[%c0_1, %c0_2] : memref<256x32xf32, #tpu.memory_space<vmem>>, vector<256x32xf32>
    %5 = arith.extui %3 : vector<4x256xi1> to vector<4x256xi32>
    %6 = arith.sitofp %5 : vector<4x256xi32> to vector<4x256xf32>
    %c0_i32 = arith.constant 0 : i32
    %7 = arith.cmpi eq, %arg0, %c0_i32 : i32
    %8 = arith.extui %7 : i1 to i32
    %c0_i32_3 = arith.constant 0 : i32
    %9 = arith.cmpi ne, %8, %c0_i32_3 : i32
    scf.if %9 {
      %c0_i32_5 = arith.constant 0 : i32
      %13 = arith.cmpi eq, %arg1, %c0_i32_5 : i32
      %14 = arith.extui %13 : i1 to i32
      %c0_i32_6 = arith.constant 0 : i32
      %15 = arith.cmpi ne, %14, %c0_i32_6 : i32
      scf.if %15 {
        %cst_18 = arith.constant 0.000000e+00 : f32
        %28 = vector.broadcast %cst_18 : f32 to vector<4x32xf32>
        %c0_19 = arith.constant 0 : index
        %c0_20 = arith.constant 0 : index
        %29 = vector.load %arg5[%c0_19, %c0_20] : memref<4x32xf32, #tpu.memory_space<vmem>>, vector<4x32xf32>
        tpu.vector_store %arg5[%c0_19, %c0_20], %28 {strides = array<i32>} : memref<4x32xf32, #tpu.memory_space<vmem>>, vector<4x32xf32>,
        %cst_21 = arith.constant 0.000000e+00 : f32
        %30 = vector.broadcast %cst_21 : f32 to vector<4x1xf32>
        %c0_22 = arith.constant 0 : index
        %c0_23 = arith.constant 0 : index
        %31 = vector.load %arg6[%c0_22, %c0_23] : memref<4x1xf32, #tpu.memory_space<vmem>>, vector<4x1xf32>
        tpu.vector_store %arg6[%c0_22, %c0_23], %30 {strides = array<i32>} : memref<4x1xf32, #tpu.memory_space<vmem>>, vector<4x1xf32>,
      } else {
      }
      %c0_7 = arith.constant 0 : index
      %c0_8 = arith.constant 0 : index
      %16 = vector.load %arg5[%c0_7, %c0_8] : memref<4x32xf32, #tpu.memory_space<vmem>>, vector<4x32xf32>
      %cst = arith.constant dense<0.000000e+00> : vector<4x32xf32>
      %17 = tpu.matmul %6, %4, %cst {dimension_numbers = #tpu.dot_dimension_numbers<[1], [0], [0], [1], [0, 0, 1, 1], [], []>} : vector<4x256xf32>, vector<256x32xf32>, vector<4x32xf32> -> vector<4x32xf32>
      %18 = arith.addf %16, %17 : vector<4x32xf32>
      %c0_9 = arith.constant 0 : index
      %c0_10 = arith.constant 0 : index
      %19 = vector.load %arg5[%c0_9, %c0_10] : memref<4x32xf32, #tpu.memory_space<vmem>>, vector<4x32xf32>
      tpu.vector_store %arg5[%c0_9, %c0_10], %18 {strides = array<i32>} : memref<4x32xf32, #tpu.memory_space<vmem>>, vector<4x32xf32>,
      %c0_11 = arith.constant 0 : index
      %c0_12 = arith.constant 0 : index
      %20 = vector.load %arg6[%c0_11, %c0_12] : memref<4x1xf32, #tpu.memory_space<vmem>>, vector<4x1xf32>
      %cst_13 = arith.constant dense<0.000000e+00> : vector<4xf32>
      %21 = vector.multi_reduction <add>, %6, %cst_13 [1] : vector<4x256xf32> to vector<4xf32>
      %22 = vector.shape_cast %21 : vector<4xf32> to vector<4x1xf32>
      %23 = arith.addf %20, %22 : vector<4x1xf32>
      %c0_14 = arith.constant 0 : index
      %c0_15 = arith.constant 0 : index
      %24 = vector.load %arg6[%c0_14, %c0_15] : memref<4x1xf32, #tpu.memory_space<vmem>>, vector<4x1xf32>
      tpu.vector_store %arg6[%c0_14, %c0_15], %23 {strides = array<i32>} : memref<4x1xf32, #tpu.memory_space<vmem>>, vector<4x1xf32>,
      %c0_i32_16 = arith.constant 0 : i32
      %25 = arith.cmpi eq, %arg1, %c0_i32_16 : i32
      %26 = arith.extui %25 : i1 to i32
      %c0_i32_17 = arith.constant 0 : i32
      %27 = arith.cmpi ne, %26, %c0_i32_17 : i32
      scf.if %27 {
        %c0_18 = arith.constant 0 : index
        %c0_19 = arith.constant 0 : index
        %28 = vector.load %arg6[%c0_18, %c0_19] : memref<4x1xf32, #tpu.memory_space<vmem>>, vector<4x1xf32>
        %cst_20 = arith.constant 5.000000e-01 : f32
        %29 = vector.broadcast %cst_20 : f32 to vector<4x1xf32>
        %30 = arith.cmpf ogt, %28, %29 : vector<4x1xf32>
        %31 = arith.extui %30 : vector<4x1xi1> to vector<4x1xi32>
        %32 = arith.sitofp %31 : vector<4x1xi32> to vector<4x1xf32>
        %cst_21 = arith.constant 1.000000e+00 : f32
        %33 = vector.broadcast %cst_21 : f32 to vector<4x1xf32>
        %34 = arith.maximumf %28, %33 : vector<4x1xf32>
        %35 = arith.divf %32, %34 : vector<4x1xf32>
        %c0_22 = arith.constant 0 : index
        %c0_23 = arith.constant 0 : index
        %36 = vector.load %arg5[%c0_22, %c0_23] : memref<4x32xf32, #tpu.memory_space<vmem>>, vector<4x32xf32>
        %37 = vector.broadcast %35 : vector<4x1xf32> to vector<4x32xf32>
        %38 = arith.mulf %36, %37 : vector<4x32xf32>
        %c0_24 = arith.constant 0 : index
        %c0_25 = arith.constant 0 : index
        %39 = vector.load %arg5[%c0_24, %c0_25] : memref<4x32xf32, #tpu.memory_space<vmem>>, vector<4x32xf32>
        tpu.vector_store %arg5[%c0_24, %c0_25], %38 {strides = array<i32>} : memref<4x32xf32, #tpu.memory_space<vmem>>, vector<4x32xf32>,
        %c0_26 = arith.constant 0 : index
        %c0_27 = arith.constant 0 : index
        %40 = vector.load %arg6[%c0_26, %c0_27] : memref<4x1xf32, #tpu.memory_space<vmem>>, vector<4x1xf32>
        tpu.vector_store %arg6[%c0_26, %c0_27], %35 {strides = array<i32>} : memref<4x1xf32, #tpu.memory_space<vmem>>, vector<4x1xf32>,
      } else {
      }
    } else {
    }
    %c1_i32 = arith.constant 1 : i32
    %10 = arith.cmpi eq, %arg0, %c1_i32 : i32
    %11 = arith.extui %10 : i1 to i32
    %c0_i32_4 = arith.constant 0 : i32
    %12 = arith.cmpi ne, %11, %c0_i32_4 : i32
    scf.if %12 {
      %c0_i32_5 = arith.constant 0 : i32
      %13 = arith.cmpi eq, %arg1, %c0_i32_5 : i32
      %14 = arith.extui %13 : i1 to i32
      %c0_i32_6 = arith.constant 0 : i32
      %15 = arith.cmpi ne, %14, %c0_i32_6 : i32
      scf.if %15 {
        %cst_22 = arith.constant 0.000000e+00 : f32
        %42 = vector.broadcast %cst_22 : f32 to vector<1x1xf32>
        %c0_23 = arith.constant 0 : index
        %c0_24 = arith.constant 0 : index
        %43 = vector.load %arg7[%c0_23, %c0_24] : memref<1x1xf32, #tpu.memory_space<vmem>>, vector<1x1xf32>
        tpu.vector_store %arg7[%c0_23, %c0_24], %42 {strides = array<i32>} : memref<1x1xf32, #tpu.memory_space<vmem>>, vector<1x1xf32>,
      } else {
      }
      %c0_7 = arith.constant 0 : index
      %c0_8 = arith.constant 0 : index
      %16 = vector.load %arg5[%c0_7, %c0_8] : memref<4x32xf32, #tpu.memory_space<vmem>>, vector<4x32xf32>
      %cst = arith.constant dense<0.000000e+00> : vector<256x32xf32>
      %17 = tpu.matmul %6, %16, %cst {dimension_numbers = #tpu.dot_dimension_numbers<[0], [0], [1], [1], [0, 1, 1, 1], [], []>} : vector<4x256xf32>, vector<4x32xf32>, vector<256x32xf32> -> vector<256x32xf32>
      %c0_9 = arith.constant 0 : index
      %c0_10 = arith.constant 0 : index
      %18 = vector.load %arg6[%c0_9, %c0_10] : memref<4x1xf32, #tpu.memory_space<vmem>>, vector<4x1xf32>
      %cst_11 = arith.constant dense<0.000000e+00> : vector<256x1xf32>
      %19 = tpu.matmul %6, %18, %cst_11 {dimension_numbers = #tpu.dot_dimension_numbers<[0], [0], [1], [1], [0, 1, 1, 1], [], []>} : vector<4x256xf32>, vector<4x1xf32>, vector<256x1xf32> -> vector<256x1xf32>
      %20 = arith.subf %4, %17 : vector<256x32xf32>
      %21 = arith.mulf %20, %20 : vector<256x32xf32>
      %cst_12 = arith.constant dense<0.000000e+00> : vector<256xf32>
      %22 = vector.multi_reduction <add>, %21, %cst_12 [1] : vector<256x32xf32> to vector<256xf32>
      %23 = vector.shape_cast %22 : vector<256xf32> to vector<256x1xf32>
      %24 = math.sqrt %23 : vector<256x1xf32>
      %cst_13 = arith.constant 1.000000e+00 : f32
      %25 = vector.broadcast %cst_13 : f32 to vector<256x1xf32>
      %26 = arith.subf %24, %25 : vector<256x1xf32>
      %cst_14 = arith.constant 0.000000e+00 : f32
      %27 = vector.broadcast %cst_14 : f32 to vector<256x1xf32>
      %28 = arith.maximumf %26, %27 : vector<256x1xf32>
      %c0_15 = arith.constant 0 : index
      %c0_16 = arith.constant 0 : index
      %29 = vector.load %arg7[%c0_15, %c0_16] : memref<1x1xf32, #tpu.memory_space<vmem>>, vector<1x1xf32>
      %30 = arith.mulf %28, %28 : vector<256x1xf32>
      %31 = arith.mulf %30, %19 : vector<256x1xf32>
      %32 = vector.shape_cast %31 : vector<256x1xf32> to vector<1x256x1xf32>
      %cst_17 = arith.constant dense<0.000000e+00> : vector<1xf32>
      %33 = vector.multi_reduction <add>, %32, %cst_17 [1, 2] : vector<1x256x1xf32> to vector<1xf32>
      %34 = vector.shape_cast %33 : vector<1xf32> to vector<1x1x1xf32>
      %35 = vector.extract %34[0, 0, 0] : f32 from vector<1x1x1xf32>
      %36 = vector.broadcast %35 : f32 to vector<1x1xf32>
      %37 = arith.addf %29, %36 : vector<1x1xf32>
      %c0_18 = arith.constant 0 : index
      %c0_19 = arith.constant 0 : index
      %38 = vector.load %arg7[%c0_18, %c0_19] : memref<1x1xf32, #tpu.memory_space<vmem>>, vector<1x1xf32>
      tpu.vector_store %arg7[%c0_18, %c0_19], %37 {strides = array<i32>} : memref<1x1xf32, #tpu.memory_space<vmem>>, vector<1x1xf32>,
      %c0_i32_20 = arith.constant 0 : i32
      %39 = arith.cmpi eq, %arg1, %c0_i32_20 : i32
      %40 = arith.extui %39 : i1 to i32
      %c0_i32_21 = arith.constant 0 : i32
      %41 = arith.cmpi ne, %40, %c0_i32_21 : i32
      scf.if %41 {
        %c0_22 = arith.constant 0 : index
        %c0_23 = arith.constant 0 : index
        %42 = vector.load %arg5[%c0_22, %c0_23] : memref<4x32xf32, #tpu.memory_space<vmem>>, vector<4x32xf32>
        %c0_24 = arith.constant 0 : index
        %c0_25 = arith.constant 0 : index
        %43 = vector.load %arg6[%c0_24, %c0_25] : memref<4x1xf32, #tpu.memory_space<vmem>>, vector<4x1xf32>
        %cst_26 = arith.constant 0.000000e+00 : f32
        %44 = vector.broadcast %cst_26 : f32 to vector<4x1xf32>
        %45 = arith.cmpf ogt, %43, %44 : vector<4x1xf32>
        %46 = arith.extui %45 : vector<4x1xi1> to vector<4x1xi32>
        %47 = arith.sitofp %46 : vector<4x1xi32> to vector<4x1xf32>
        %48 = vector.shape_cast %47 : vector<4x1xf32> to vector<1x4x1xf32>
        %cst_27 = arith.constant dense<0.000000e+00> : vector<1xf32>
        %49 = vector.multi_reduction <add>, %48, %cst_27 [1, 2] : vector<1x4x1xf32> to vector<1xf32>
        %50 = vector.shape_cast %49 : vector<1xf32> to vector<1x1x1xf32>
        %51 = vector.extract %50[0, 0, 0] : f32 from vector<1x1x1xf32>
        %52 = vector.broadcast %51 : f32 to vector<1x1xf32>
        %cst_28 = arith.constant 1.000000e+00 : f32
        %53 = vector.broadcast %cst_28 : f32 to vector<1x1xf32>
        %54 = arith.maximumf %52, %53 : vector<1x1xf32>
        %cst_29 = arith.constant dense<0.000000e+00> : vector<4x4xf32>
        %55 = tpu.matmul %42, %42, %cst_29 {dimension_numbers = #tpu.dot_dimension_numbers<[1], [1], [0], [0], [0, 0, 1, 0], [], []>} : vector<4x32xf32>, vector<4x32xf32>, vector<4x4xf32> -> vector<4x4xf32>
        %56 = tpu.iota {dimensions = array<i32: 0>} : vector<4x4xi32>
        %57 = tpu.iota {dimensions = array<i32: 1>} : vector<4x4xi32>
        %58 = arith.cmpi eq, %56, %57 : vector<4x4xi32>
        %59 = arith.extui %58 : vector<4x4xi1> to vector<4x4xi32>
        %60 = arith.sitofp %59 : vector<4x4xi32> to vector<4x4xf32>
        %61 = arith.mulf %55, %60 : vector<4x4xf32>
        %cst_30 = arith.constant dense<0.000000e+00> : vector<4xf32>
        %62 = vector.multi_reduction <add>, %61, %cst_30 [1] : vector<4x4xf32> to vector<4xf32>
        %63 = vector.shape_cast %62 : vector<4xf32> to vector<4x1xf32>
        %64 = arith.mulf %55, %60 : vector<4x4xf32>
        %cst_31 = arith.constant dense<0.000000e+00> : vector<4xf32>
        %65 = vector.multi_reduction <add>, %64, %cst_31 [0] : vector<4x4xf32> to vector<4xf32>
        %66 = vector.shape_cast %65 : vector<4xf32> to vector<1x4xf32>
        %67 = vector.broadcast %47 : vector<4x1xf32> to vector<4x4xf32>
        %68 = arith.mulf %60, %67 : vector<4x4xf32>
        %cst_32 = arith.constant dense<0.000000e+00> : vector<4xf32>
        %69 = vector.multi_reduction <add>, %68, %cst_32 [0] : vector<4x4xf32> to vector<4xf32>
        %70 = vector.shape_cast %69 : vector<4xf32> to vector<1x4xf32>
        %71 = vector.broadcast %63 : vector<4x1xf32> to vector<4x4xf32>
        %72 = vector.broadcast %66 : vector<1x4xf32> to vector<4x4xf32>
        %73 = arith.addf %71, %72 : vector<4x4xf32>
        %cst_33 = arith.constant 2.000000e+00 : f32
        %74 = vector.broadcast %cst_33 : f32 to vector<4x4xf32>
        %75 = arith.mulf %74, %55 : vector<4x4xf32>
        %76 = arith.subf %73, %75 : vector<4x4xf32>
        %cst_34 = arith.constant 0.000000e+00 : f32
        %77 = vector.broadcast %cst_34 : f32 to vector<4x4xf32>
        %78 = arith.maximumf %76, %77 : vector<4x4xf32>
        %79 = math.sqrt %78 : vector<4x4xf32>
        %80 = vector.broadcast %47 : vector<4x1xf32> to vector<4x4xf32>
        %81 = vector.broadcast %70 : vector<1x4xf32> to vector<4x4xf32>
        %82 = arith.mulf %80, %81 : vector<4x4xf32>
        %cst_35 = arith.constant 1.000000e+00 : f32
        %83 = vector.broadcast %cst_35 : f32 to vector<4x4xf32>
        %84 = arith.subf %83, %60 : vector<4x4xf32>
        %85 = arith.mulf %82, %84 : vector<4x4xf32>
        %cst_36 = arith.constant 3.000000e+00 : f32
        %86 = vector.broadcast %cst_36 : f32 to vector<4x4xf32>
        %87 = arith.subf %86, %79 : vector<4x4xf32>
        %cst_37 = arith.constant 0.000000e+00 : f32
        %88 = vector.broadcast %cst_37 : f32 to vector<4x4xf32>
        %89 = arith.maximumf %87, %88 : vector<4x4xf32>
        %90 = arith.mulf %89, %85 : vector<4x4xf32>
        %91 = arith.mulf %90, %90 : vector<4x4xf32>
        %92 = vector.shape_cast %91 : vector<4x4xf32> to vector<1x4x4xf32>
        %cst_38 = arith.constant dense<0.000000e+00> : vector<1xf32>
        %93 = vector.multi_reduction <add>, %92, %cst_38 [1, 2] : vector<1x4x4xf32> to vector<1xf32>
        %94 = vector.shape_cast %93 : vector<1xf32> to vector<1x1x1xf32>
        %95 = vector.extract %94[0, 0, 0] : f32 from vector<1x1x1xf32>
        %96 = vector.broadcast %95 : f32 to vector<1x1xf32>
        %cst_39 = arith.constant 1.000000e+00 : f32
        %97 = vector.broadcast %cst_39 : f32 to vector<1x1xf32>
        %98 = arith.subf %52, %97 : vector<1x1xf32>
        %99 = arith.mulf %52, %98 : vector<1x1xf32>
        %cst_40 = arith.constant 5.000000e-01 : f32
        %100 = vector.broadcast %cst_40 : f32 to vector<1x1xf32>
        %101 = arith.cmpf ogt, %99, %100 : vector<1x1xf32>
        %cst_41 = arith.constant 1.000000e+00 : f32
        %102 = vector.broadcast %cst_41 : f32 to vector<1x1xf32>
        %103 = arith.maximumf %99, %102 : vector<1x1xf32>
        %104 = arith.divf %96, %103 : vector<1x1xf32>
        %cst_42 = arith.constant 0.000000e+00 : f32
        %105 = vector.broadcast %cst_42 : f32 to vector<1x1xf32>
        %106 = arith.select %101, %104, %105 : vector<1x1xi1>, vector<1x1xf32>
        %107 = math.sqrt %63 : vector<4x1xf32>
        %108 = vector.shape_cast %107 : vector<4x1xf32> to vector<1x4x1xf32>
        %cst_43 = arith.constant dense<0.000000e+00> : vector<1xf32>
        %109 = vector.multi_reduction <add>, %108, %cst_43 [1, 2] : vector<1x4x1xf32> to vector<1xf32>
        %110 = vector.shape_cast %109 : vector<1xf32> to vector<1x1x1xf32>
        %111 = vector.extract %110[0, 0, 0] : f32 from vector<1x1x1xf32>
        %112 = vector.broadcast %111 : f32 to vector<1x1xf32>
        %113 = arith.divf %112, %54 : vector<1x1xf32>
        %c0_44 = arith.constant 0 : index
        %c0_45 = arith.constant 0 : index
        %114 = vector.load %arg7[%c0_44, %c0_45] : memref<1x1xf32, #tpu.memory_space<vmem>>, vector<1x1xf32>
        %115 = arith.divf %114, %54 : vector<1x1xf32>
        %cst_46 = arith.constant 1.000000e+00 : f32
        %116 = vector.broadcast %cst_46 : f32 to vector<1x1xf32>
        %117 = arith.mulf %116, %115 : vector<1x1xf32>
        %cst_47 = arith.constant 1.000000e+00 : f32
        %118 = vector.broadcast %cst_47 : f32 to vector<1x1xf32>
        %119 = arith.mulf %118, %106 : vector<1x1xf32>
        %120 = arith.addf %117, %119 : vector<1x1xf32>
        %cst_48 = arith.constant 1.000000e-03 : f32
        %121 = vector.broadcast %cst_48 : f32 to vector<1x1xf32>
        %122 = arith.mulf %121, %113 : vector<1x1xf32>
        %123 = arith.addf %120, %122 : vector<1x1xf32>
        %c0_49 = arith.constant 0 : index
        %c0_50 = arith.constant 0 : index
        %124 = vector.load %arg4[%c0_49, %c0_50] : memref<1x1xf32, #tpu.memory_space<vmem>>, vector<1x1xf32>
        tpu.vector_store %arg4[%c0_49, %c0_50], %123 {strides = array<i32>} : memref<1x1xf32, #tpu.memory_space<vmem>>, vector<1x1xf32>,
      } else {
      }
    } else {
    }
    return
  }
  func.func @transform_0(%arg0: i32, %arg1: i32) -> (i32, i32) {
    %c0_i32 = arith.constant 0 : i32
    %c0_i32_0 = arith.constant 0 : i32
    return %arg1, %c0_i32 : i32, i32
  }
  func.func @transform_1(%arg0: i32, %arg1: i32) -> (i32, i32) {
    %c0_i32 = arith.constant 0 : i32
    %c0_i32_0 = arith.constant 0 : i32
    return %c0_i32, %arg1 : i32, i32
  }
  func.func @transform_2(%arg0: i32, %arg1: i32) -> (i32, i32) {
    %c0_i32 = arith.constant 0 : i32
    %c0_i32_0 = arith.constant 0 : i32
    %c0_i32_1 = arith.constant 0 : i32
    return %c0_i32, %c0_i32_0 : i32, i32
  }
}

</mosaic_0001>

<bundles_post_ra>
// kernel: tpu_custom_call.1
= control target key start
LH: loop header
LB: loop body
LE: loop exit
PB: predicated region body
PF: predicated region fallthrough
CT: control target
= control target key end

     0   :  { %7 = vsyncpa [#allocation6], 0  ;;  %s2107_s9 = smov 0   ;;  %s2109_s10 = smov 0   ;;  %s3104_s0 = inlined_call_operand.vmem [shape: f32[256,32], index: 0, kind: input, shape index: {}]   ;;  %s3105_s1 = inlined_call_operand.vmem [shape: s32[1,256], index: 1, kind: input, shape index: {}]   ;;  %s3106_s2 = inlined_call_operand.hbm [shape: f32[1,1], index: 2, kind: output, shape index: {}]  }
   0x1   :  { %s2111_s11 = smov 0  }
   0x2 LB: > { %s1704_s12 = sadd.s32 4294967295, %s2083_s11   ;;  %s25_s13 = sadd.s32 1, %s2079_s10  ;;  %s2083_s11 = sphi %s2111_s11, %s13_s11   ;;  %s2079_s10 = sphi %s2109_s10, %s3112_s10   ;;  %s2075_s9 = sphi %s2107_s9, %s3111_s9  }
   0x3   : > { %p27_p0 = scmp.ge.s32.totalorder %s25_s13, 2  ;;  %p1708_p1 = scmp.ge.s32.totalorder %s2083_s11, 1 }
   0x4   : > { %p131_p2 = scmp.lt.s32.totalorder %s2083_s11, 3 }
   0x5   : > { %s3114_s13 = smov (%p27_p0, %s25_s13), 0 }
   0x6   : > { %p132_p3 = pnand %p1708_p1, %p131_p2 }
   0x7   : > { %p1711_p4 = scmp.ne.s32.totalorder (!%p132_p3), %s2075_s9, 0 }
   0x8   : > { %135 = sbr.rel (%p132_p3) target bundleno = 1135 (0x46f), region = 28 }
   0xd   : > { %v163_v0 = vld [vmem:[%s3105_s1] sm:$0x3]  ;;  %v164_v1 = vlaneseq  ;;  %v2139_v3 = vld [vmem:[%s3104_s0 + $0x8] sm:$0xff]  ;;  %v2144_v6 = vld [vmem:[%s3104_s0 + $0x10] sm:$0xff]  ;;  %v2085_v24 = vmov 0.0  }
   0xe   : > { %v2134_v2 = vld [vmem:[%s3104_s0] sm:$0xff]  ;;  %v166_v4 = vperm.slane %v163_v0, 0  ;;  %v167_v5 = vperm.slane %v163_v0, 1  ;;  %v2149_v7 = vld [vmem:[%s3104_s0 + $0x18] sm:$0xff]  ;;  %v2162_v10 = vld [vmem:[%s3104_s0 + $0x28] sm:$0xff] }
   0xf   : > { %v2154_v8 = vld [vmem:[%s3104_s0 + $0x20] sm:$0xff]  ;;  %v2157_v9 = vshrl.u32 %v164_v1, 7  ;;  %v2167_v11 = vld [vmem:[%s3104_s0 + $0x30] sm:$0xff]  ;;  %v2172_v12 = vld [vmem:[%s3104_s0 + $0x38] sm:$0xff] }
  0x10   : > { %v2177_v13 = vld [vmem:[%s3104_s0 + $0x40] sm:$0xff]  ;;  %v2182_v14 = vld [vmem:[%s3104_s0 + $0x48] sm:$0xff]  ;;  %v2187_v15 = vld [vmem:[%s3104_s0 + $0x50] sm:$0xff] }
  0x11   : > { %vm2190_vm0 = vcmp.eq.s32.totalorder %v166_v4, %v2157_v9  ;;  %vm2195_vm1 = vcmp.eq.s32.totalorder %v167_v5, %v2157_v9  ;;  %v2202_v18 = vld [vmem:[%s3104_s0 + $0x58] sm:$0xff]  ;;  %v2207_v19 = vld [vmem:[%s3104_s0 + $0x60] sm:$0xff]  ;;  %v2212_v20 = vld [vmem:[%s3104_s0 + $0x68] sm:$0xff] }
  0x12   : > { %v2217_v21 = vld [vmem:[%s3104_s0 + $0x70] sm:$0xff]  ;;  %v2222_v22 = vld [vmem:[%s3104_s0 + $0x78] sm:$0xff]  ;;  %v2227_v23 = vld [vmem:[%s3104_s0 + $0x80] sm:$0xff]  ;;  %v2231_v25 = vsel %vm2190_vm0, 1.0, %v2085_v24  ;;  %v2235_v26 = vsel %vm2195_vm1, 1.0, %v2085_v24 }
  0x13   : > { %v2240_v27 = vld [vmem:[%s3104_s0 + $0x88] sm:$0xff]  ;;  %v2245_v28 = vld [vmem:[%s3104_s0 + $0x90] sm:$0xff]  ;;  %v2250_v29 = vld [vmem:[%s3104_s0 + $0x98] sm:$0xff]  ;;  %209 = sbr.rel (%p1711_p4) target bundleno = 293 (0x125), region = 32 }
  0x14   : > { %v2255_v30 = vld [vmem:[%s3104_s0 + $0xa0] sm:$0xff]  ;;  %v2260_v31 = vld [vmem:[%s3104_s0 + $0xa8] sm:$0xff]  ;;  %v2265_v32 = vld [vmem:[%s3104_s0 + $0xb0] sm:$0xff] }
  0x15   : > { %v2270_v33 = vld [vmem:[%s3104_s0 + $0xb8] sm:$0xff]  ;;  %v2275_v34 = vld [vmem:[%s3104_s0 + $0xc0] sm:$0xff]  ;;  %v2280_v35 = vld [vmem:[%s3104_s0 + $0xc8] sm:$0xff] }
  0x16   : > { %v2285_v36 = vld [vmem:[%s3104_s0 + $0xd0] sm:$0xff]  ;;  %v2290_v37 = vld [vmem:[%s3104_s0 + $0xd8] sm:$0xff]  ;;  %v2295_v38 = vld [vmem:[%s3104_s0 + $0xe0] sm:$0xff] }
  0x17   : > { %v2300_v39 = vld [vmem:[%s3104_s0 + $0xe8] sm:$0xff]  ;;  %v2305_v40 = vld [vmem:[%s3104_s0 + $0xf0] sm:$0xff]  ;;  %v2310_v41 = vld [vmem:[%s3104_s0 + $0xf8] sm:$0xff] }
  0x18   : > { %vm263_vm2 = vcmask 1043456   ;;  %219 = vmatpush.msra.mxu0 %v2222_v22  ;;  %239 = vmatpush.msra.mxu1 %v2310_v41  ;;  %vm216_vm3 = vcmask 3072   ;;  %v2086_v45 = vmov 0.0   ;;  %v2087_v46 = vmov 1.0  }
  0x19   : > { %v264_v42 = vsel %vm263_vm2, %v2231_v25, 0.0  ;;  %v265_v43 = vsel %vm263_vm2, %v2235_v26, 0.0  ;;  %217 = vst.msk [vmem:[#allocation3] sm:$0xf] %vm216_vm3, %v2086_v45  ;;  %v2088_v47 = vmov 0   ;;  %vm214_vm9 = vcmask 257024  }
  0x1a   : > { %v266_v44 = vadd.f32 %v265_v43, %v264_v42  ;;  %220 = vmatpush.msra.mxu0 %v2217_v21  ;;  %240 = vmatpush.msra.mxu1 %v2305_v40  ;;  %215 = vst.msk [vmem:[#allocation2] sm:$0xf] %vm214_vm9, %v2086_v45 }
  0x1b   : > { %1870 = vset.pattern.permute.xlu0 %v2088_v47 }
  0x1c   : > { %267 = vadd.xlane.f32.xlu0 %v266_v44  ;;  %221 = vmatpush.msra.mxu0 %v2212_v20 }
  0x1d   : > { %241 = vmatpush.msra.mxu1 %v2300_v39 }
  0x1e   : > { %222 = vmatpush.msra.mxu0 %v2207_v19 }
  0x1f   : > { %242 = vmatpush.msra.mxu1 %v2295_v38 }
  0x20   : > { %223 = vmatpush.msra.mxu0 %v2202_v18  ;;  %v262_v48 = vld [vmem:[#allocation3] sm:$0xf] }
  0x21   : > { %243 = vmatpush.msra.mxu1 %v2290_v37  ;;  %v218_v5 = vld [vmem:[#allocation2] sm:$0xf] }
  0x22   : > { %224 = vmatpush.msra.mxu0 %v2187_v15 }
  0x23   : > { %244 = vmatpush.msra.mxu1 %v2285_v36 }
  0x24   : > { %225 = vmatpush.msra.mxu0 %v2182_v14 }
  0x25   : > { %245 = vmatpush.msra.mxu1 %v2280_v35 }
  0x26   : > { %226 = vmatpush.msra.mxu0 %v2177_v13 }
  0x27   : > { %246 = vmatpush.msra.mxu1 %v2275_v34 }
  0x28   : > { %227 = vmatpush.msra.mxu0 %v2172_v12 }
  0x29   : > { %247 = vmatpush.msra.mxu1 %v2270_v33 }
  0x2a   : > { %228 = vmatpush.msra.mxu0 %v2167_v11 }
  0x2b   : > { %248 = vmatpush.msra.mxu1 %v2265_v32 }
  0x2c   : > { %229 = vmatpush.msra.mxu0 %v2162_v10 }
  0x2d   : > { %249 = vmatpush.msra.mxu1 %v2260_v31 }
  0x2e   : > { %230 = vmatpush.msra.mxu0 %v2154_v8 }
  0x2f   : > { %250 = vmatpush.msra.mxu1 %v2255_v30 }
  0x30   : > { %231 = vmatpush.msra.mxu0 %v2149_v7 }
  0x31   : > { %251 = vmatpush.msra.mxu1 %v2250_v29 }
  0x32   : > { %232 = vmatpush.msra.mxu0 %v2144_v6 }
  0x33   : > { %252 = vmatpush.msra.mxu1 %v2245_v28 }
  0x34   : > { %233 = vmatpush.msra.mxu0 %v2139_v3 }
  0x35   : > { %253 = vmatpush.msra.mxu1 %v2240_v27 }
  0x36   : > { %234 = vmatpush.msra.mxu0 %v2134_v2 }
  0x37   : > { %254 = vmatpush.msra.mxu1 %v2227_v23  ;;  %1712 = vmatmul.msk.f32.vlgmr.msra.gmra.mxu0 %vm2190_vm0, %v2087_v46 }
  0x38   : > { %1713 = vmatmul.msk.f32.vlgmr.msra.gmra.mxu1 %vm2195_vm1, %v2087_v46 }
  0x8f   : > { %v268_v49 = vpop.xlane.xlu0 %267 }
  0x90   : > { %v269_v50 = vadd.f32 %v268_v49, %v262_v48 }
  0x92   : > { %271 = vst.msk [vmem:[#allocation3] sm:$0xf] %vm216_vm3, %v269_v50 }
  0x99   : > { %v275_v51 = vld [vmem:[#allocation3] sm:$0xf] }
  0x9a   : > { %v279_v52 = vmax.f32 %v275_v51, 1.0  ;;  %vm276_vm5 = vcmp.gt.f32.partialorder %v275_v51, 0.5 }
  0x9b   : > { %v1714_v62 = vsel %vm276_vm5, 1.0, %v2086_v45 }
  0x9c   : > { %1871 = vrcp.f32 %v279_v52  ;;  %v291_v56 = vand.u32 2147483648, %v279_v52  ;;  %v289_v58 = vand.u32 2147483647, %v279_v52  ;;  %vm285_vm6 = vweird.f32 %v279_v52 }
  0x9e   : > { %v292_v60 = vor.u32 1.1754944e-38, %v291_v56  ;;  %vm290_vm8 = vcmp.eq.f32.partialorder %v289_v58, 8.507059e+37 }
  0xa2   : > { %v1872_v53 = vpop.eup %1871 }
  0xa3   : > { %v281_v54 = vmul.f32 %v1872_v53, %v279_v52  ;;  %vm286_vm4 = vweird.f32 %v1872_v53 }
  0xa4   : > { %vm287_vm7 = vmor %vm285_vm6, %vm286_vm4 }
  0xa5   : > { %v282_v55 = vsub.f32 1.0, %v281_v54 }
  0xa7   : > { %v283_v57 = vmul.f32 %v1872_v53, %v282_v55 }
  0xa9   : > { %v284_v59 = vadd.f32 %v1872_v53, %v283_v57 }
  0xab   : > { %v288_v61 = vsel %vm287_vm7, %v1872_v53, %v284_v59 }
  0xac   : > { %v293_v63 = vsel %vm290_vm8, %v292_v60, %v288_v61 }
  0xad   : > { %v294_v0 = vmul.f32 %v1714_v62, %v293_v63 }
  0xaf   : > { %298 = vperm.xlu0 %1870, %v294_v0   ;;  %303 = vst.msk [vmem:[#allocation3] sm:$0xf] %vm216_vm3, %v294_v0 }
  0xb4   : > { %v236_v4 = vpop.f32.mrf.mxu0 }
  0xb5   : > { %v256_v16 = vpop.f32.mrf.mxu1 }
  0xb6   : > { %v257_v17 = vadd.f32 %v256_v16, %v236_v4 }
  0xb8   : > { %v259_v24 = vadd.f32 %v257_v17, %v218_v5 }
  0xba   : > { %261 = vst.msk [vmem:[#allocation2] sm:$0xf] %vm214_vm9, %v259_v24 }
  0xc1   : > { %v295_v42 = vld [vmem:[#allocation2] sm:$0xf] }
 0x121   : > { %v299_v43 = vpop.permute.xlu0 %298 }
 0x122   : > { %v301_v44 = vmul.f32 %v299_v43, %v295_v42 }
 0x124   : > { %302 = vst.msk [vmem:[#allocation2] sm:$0xf] %vm214_vm9, %v301_v44 }
 0x125 PF: > { %p1715_p5 = scmp.ne.s32.totalorder %s2075_s9, 1 }
 0x127   : > { %307 = sbr.rel (%p1715_p5) target bundleno = 1129 (0x469), region = 44 }
 0x12c   : > { %v1873_v46 = vpack.i.bf16 %v2235_v26, %v2231_v25  ;;  %v314_v47 = vld [vmem:[#allocation2] sm:$0xf]  ;;  %vm476_vm10 = vcmask 1043456   ;;  %v593_v45 = vld [vmem:[#allocation3] sm:$0xf]  ;;  %vm379_vm11 = vcmask 31744  }
 0x12d   : > { %1716 = vmatpush.msk.msra.mxu0 %vm476_vm10, %v314_v47  ;;  %1749 = vmatpush.msk.msra.mxu1 %vm476_vm10, %v593_v45  ;;  %vm774_vm12 = vcmask 261120   ;;  %v2374_v57 = vld [vmem:[#allocation2] sm:$0xf]  ;;  %vm1384_vm4 = vcmask 7168   ;;  %vm1511_vm5 = vcmask 27648   ;;  %vm312_vm8 = vcmask 0  }
 0x12e   : > { %1874 = vxpose.xlu0.b32.start.end [1/1] (short) %v1873_v46, 128  ;;  %1823 = vmatpush.msk.msra.mxu3 %vm476_vm10, %v314_v47 }
 0x12f   : > { %1824 = vmatpush.msk.msra.mxu2 %vm476_vm10, %v593_v45 }
 0x131   : > { %1815 = vmatpush.xpose.msk.msrb.mxu2 %vm774_vm12, %v2374_v57 }
 0x1d2   : > { %v2357_v48 = vpop.trf.xlu0 }
 0x1d3   : > { %v1876_v49 = vunpack.i.l.bf16 %v2357_v48 }
 0x1d5   : > { %1717 = vmatmul.msk.f32.vlgmr.msra.gmra.mxu0 %vm379_vm11, %v1876_v49  ;;  %1750 = vmatmul.msk.f32.vlgmr.msra.gmra.mxu1 %vm379_vm11, %v1876_v49 }
 0x1da   : > { %v1880_v50 = vpop.trf.xlu0 }
 0x1db   : > { %v1881_v51 = vunpack.i.l.bf16 %v1880_v50  ;;  %v1884_v25 = vunpack.i.h.bf16 %v1880_v50 }
 0x1dd   : > { %1718 = vmatmul.msk.f32.gmra.mxu0 %vm379_vm11, %v1881_v51  ;;  %1734 = vmatmul.msk.f32.vlgmr.msra.gmra.mxu3 %vm379_vm11, %v1884_v25 }
 0x1de   : > { %1751 = vmatmul.msk.f32.gmra.mxu1 %vm379_vm11, %v1881_v51  ;;  %1767 = vmatmul.msk.f32.vlgmr.msra.gmra.mxu2 %vm379_vm11, %v1884_v25 }
 0x1e2   : > { %v1885_v26 = vpop.trf.xlu0 }
 0x1e3   : > { %v1886_v52 = vunpack.i.l.bf16 %v1885_v26  ;;  %v1889_v53 = vunpack.i.h.bf16 %v1885_v26 }
 0x1e5   : > { %1719 = vmatmul.msk.f32.gmra.mxu0 %vm379_vm11, %v1886_v52  ;;  %1735 = vmatmul.msk.f32.gmra.mxu3 %vm379_vm11, %v1889_v53 }
 0x1e6   : > { %1752 = vmatmul.msk.f32.gmra.mxu1 %vm379_vm11, %v1886_v52  ;;  %1768 = vmatmul.msk.f32.gmra.mxu2 %vm379_vm11, %v1889_v53 }
 0x1ea   : > { %v1890_v54 = vpop.trf.xlu0 }
 0x1eb   : > { %v1891_v55 = vunpack.i.l.bf16 %v1890_v54  ;;  %v1894_v56 = vunpack.i.h.bf16 %v1890_v54 }
 0x1ed   : > { %1720 = vmatmul.msk.f32.gmra.mxu0 %vm379_vm11, %v1891_v55  ;;  %1736 = vmatmul.msk.f32.gmra.mxu3 %vm379_vm11, %v1894_v56 }
 0x1ee   : > { %1753 = vmatmul.msk.f32.gmra.mxu1 %vm379_vm11, %v1891_v55  ;;  %1769 = vmatmul.msk.f32.gmra.mxu2 %vm379_vm11, %v1894_v56 }
 0x1f2   : > { %v1895_v58 = vpop.trf.xlu0 }
 0x1f3   : > { %v1896_v59 = vunpack.i.l.bf16 %v1895_v58  ;;  %v1899_v60 = vunpack.i.h.bf16 %v1895_v58 }
 0x1f5   : > { %1721 = vmatmul.msk.f32.gmra.mxu0 %vm379_vm11, %v1896_v59  ;;  %1737 = vmatmul.msk.f32.gmra.mxu3 %vm379_vm11, %v1899_v60 }
 0x1f6   : > { %1754 = vmatmul.msk.f32.gmra.mxu1 %vm379_vm11, %v1896_v59  ;;  %1770 = vmatmul.msk.f32.gmra.mxu2 %vm379_vm11, %v1899_v60 }
 0x1fa   : > { %v1900_v61 = vpop.trf.xlu0 }
 0x1fb   : > { %v1901_v62 = vunpack.i.l.bf16 %v1900_v61  ;;  %v1904_v63 = vunpack.i.h.bf16 %v1900_v61 }
 0x1fd   : > { %1722 = vmatmul.msk.f32.gmra.mxu0 %vm379_vm11, %v1901_v62  ;;  %1738 = vmatmul.msk.f32.gmra.mxu3 %vm379_vm11, %v1904_v63 }
 0x1fe   : > { %1755 = vmatmul.msk.f32.gmra.mxu1 %vm379_vm11, %v1901_v62  ;;  %1771 = vmatmul.msk.f32.gmra.mxu2 %vm379_vm11, %v1904_v63 }
 0x202   : > { %v1905_v0 = vpop.trf.xlu0 }
 0x203   : > { %v1906_v4 = vunpack.i.l.bf16 %v1905_v0  ;;  %v1909_v5 = vunpack.i.h.bf16 %v1905_v0 }
 0x205   : > { %1723 = vmatmul.msk.f32.gmra.mxu0 %vm379_vm11, %v1906_v4  ;;  %1739 = vmatmul.msk.f32.gmra.mxu3 %vm379_vm11, %v1909_v5 }
 0x206   : > { %1756 = vmatmul.msk.f32.gmra.mxu1 %vm379_vm11, %v1906_v4  ;;  %1772 = vmatmul.msk.f32.gmra.mxu2 %vm379_vm11, %v1909_v5 }
 0x20a   : > { %v1910_v16 = vpop.trf.xlu0 }
 0x20b   : > { %v1911_v17 = vunpack.i.l.bf16 %v1910_v16  ;;  %v1914_v24 = vunpack.i.h.bf16 %v1910_v16 }
 0x20d   : > { %1724 = vmatmul.msk.f32.gmra.mxu0 %vm379_vm11, %v1911_v17  ;;  %1740 = vmatmul.msk.f32.gmra.mxu3 %vm379_vm11, %v1914_v24 }
 0x20e   : > { %1757 = vmatmul.msk.f32.gmra.mxu1 %vm379_vm11, %v1911_v17  ;;  %1773 = vmatmul.msk.f32.gmra.mxu2 %vm379_vm11, %v1914_v24  ;;  %v1879_v17 = vunpack.i.h.bf16 %v2357_v48 }
 0x212   : > { %v1915_v42 = vpop.trf.xlu0 }
 0x213   : > { %v1916_v43 = vunpack.i.l.bf16 %v1915_v42  ;;  %v1919_v44 = vunpack.i.h.bf16 %v1915_v42 }
 0x215   : > { %1725 = vmatmul.msk.f32.gmra.mxu0 %vm379_vm11, %v1916_v43  ;;  %1741 = vmatmul.msk.f32.gmra.mxu3 %vm379_vm11, %v1919_v44 }
 0x216   : > { %1758 = vmatmul.msk.f32.gmra.mxu1 %vm379_vm11, %v1916_v43  ;;  %1774 = vmatmul.msk.f32.gmra.mxu2 %vm379_vm11, %v1919_v44 }
 0x21a   : > { %v1920_v46 = vpop.trf.xlu0 }
 0x21b   : > { %v1921_v47 = vunpack.i.l.bf16 %v1920_v46  ;;  %v1924_v45 = vunpack.i.h.bf16 %v1920_v46 }
 0x21d   : > { %1726 = vmatmul.msk.f32.gmra.mxu0 %vm379_vm11, %v1921_v47  ;;  %1742 = vmatmul.msk.f32.gmra.mxu3 %vm379_vm11, %v1924_v45 }
 0x21e   : > { %1759 = vmatmul.msk.f32.gmra.mxu1 %vm379_vm11, %v1921_v47  ;;  %1775 = vmatmul.msk.f32.gmra.mxu2 %vm379_vm11, %v1924_v45 }
 0x222   : > { %v1925_v49 = vpop.trf.xlu0 }
 0x223   : > { %v1926_v50 = vunpack.i.l.bf16 %v1925_v49  ;;  %v1929_v51 = vunpack.i.h.bf16 %v1925_v49 }
 0x225   : > { %1727 = vmatmul.msk.f32.gmra.mxu0 %vm379_vm11, %v1926_v50  ;;  %1743 = vmatmul.msk.f32.gmra.mxu3 %vm379_vm11, %v1929_v51 }
 0x226   : > { %1760 = vmatmul.msk.f32.gmra.mxu1 %vm379_vm11, %v1926_v50  ;;  %1776 = vmatmul.msk.f32.gmra.mxu2 %vm379_vm11, %v1929_v51 }
 0x22a   : > { %v1930_v25 = vpop.trf.xlu0 }
 0x22b   : > { %v1931_v26 = vunpack.i.l.bf16 %v1930_v25  ;;  %v1934_v52 = vunpack.i.h.bf16 %v1930_v25 }
 0x22d   : > { %1728 = vmatmul.msk.f32.gmra.mxu0 %vm379_vm11, %v1931_v26  ;;  %1744 = vmatmul.msk.f32.gmra.mxu3 %vm379_vm11, %v1934_v52 }
 0x22e   : > { %1761 = vmatmul.msk.f32.gmra.mxu1 %vm379_vm11, %v1931_v26  ;;  %1777 = vmatmul.msk.f32.gmra.mxu2 %vm379_vm11, %v1934_v52 }
 0x232   : > { %v1935_v53 = vpop.trf.xlu0 }
 0x233   : > { %v1936_v54 = vunpack.i.l.bf16 %v1935_v53  ;;  %v1939_v55 = vunpack.i.h.bf16 %v1935_v53 }
 0x235   : > { %1729 = vmatmul.msk.f32.gmra.mxu0 %vm379_vm11, %v1936_v54  ;;  %1745 = vmatmul.msk.f32.gmra.mxu3 %vm379_vm11, %v1939_v55 }
 0x236   : > { %1762 = vmatmul.msk.f32.gmra.mxu1 %vm379_vm11, %v1936_v54  ;;  %1778 = vmatmul.msk.f32.gmra.mxu2 %vm379_vm11, %v1939_v55 }
 0x23a   : > { %v1940_v56 = vpop.trf.xlu0 }
 0x23b   : > { %v1941_v58 = vunpack.i.l.bf16 %v1940_v56  ;;  %v1944_v59 = vunpack.i.h.bf16 %v1940_v56 }
 0x23d   : > { %1730 = vmatmul.msk.f32.gmra.mxu0 %vm379_vm11, %v1941_v58  ;;  %1746 = vmatmul.msk.f32.gmra.mxu3 %vm379_vm11, %v1944_v59 }
 0x23e   : > { %1763 = vmatmul.msk.f32.gmra.mxu1 %vm379_vm11, %v1941_v58  ;;  %1779 = vmatmul.msk.f32.gmra.mxu2 %vm379_vm11, %v1944_v59 }
 0x242   : > { %v1945_v60 = vpop.trf.xlu0 }
 0x243   : > { %v1946_v61 = vunpack.i.l.bf16 %v1945_v60  ;;  %v1949_v62 = vunpack.i.h.bf16 %v1945_v60 }
 0x245   : > { %1731 = vmatmul.msk.f32.gmra.mxu0 %vm379_vm11, %v1946_v61  ;;  %1747 = vmatmul.msk.f32.gmra.mxu3 %vm379_vm11, %v1949_v62 }
 0x246   : > { %1764 = vmatmul.msk.f32.gmra.mxu1 %vm379_vm11, %v1946_v61  ;;  %1780 = vmatmul.msk.f32.gmra.mxu2 %vm379_vm11, %v1949_v62 }
 0x24a   : > { %v1950_v63 = vpop.trf.xlu0 }
 0x24b   : > { %v1951_v0 = vunpack.i.l.bf16 %v1950_v63  ;;  %v1954_v4 = vunpack.i.h.bf16 %v1950_v63 }
 0x24d   : > { %1732 = vmatmul.msk.f32.gmra.mxu0 %vm379_vm11, %v1951_v0  ;;  %1748 = vmatmul.msk.f32.gmra.mxu3 %vm379_vm11, %v1954_v4 }
 0x24e   : > { %1765 = vmatmul.msk.f32.gmra.mxu1 %vm379_vm11, %v1951_v0  ;;  %1781 = vmatmul.msk.f32.gmra.mxu2 %vm379_vm11, %v1954_v4 }
 0x252   : > { %v497_v5 = vpop.f32.mrf.mxu0 }
 0x253   : > { %v710_v16 = vsub.f32 %v2134_v2, %v497_v5 }
 0x255   : > { %v742_v24 = vmul.f32 %v710_v16, %v710_v16  ;;  %1733 = vmatmul.msk.f32.gmra.mxu0 %vm379_vm11, %v1879_v17 }
 0x256   : > { %1766 = vmatmul.msk.f32.gmra.mxu1 %vm379_vm11, %v1879_v17  ;;  %1816 = vmatmul.msk.f32.vlgmr.msrb.gmra.mxu2 %vm774_vm12, %v2374_v57 }
 0x257   : > { %v775_v42 = vsel %vm774_vm12, %v742_v24, 0.0 }
 0x258   : > { %776 = vadd.xlane.f32.xlu0 %v775_v42 }
 0x25a   : > { %v500_v43 = vpop.f32.mrf.mxu0 }
 0x25b   : > { %v711_v44 = vsub.f32 %v2139_v3, %v500_v43 }
 0x25d   : > { %v743_v46 = vmul.f32 %v711_v44, %v711_v44 }
 0x25f   : > { %v778_v47 = vsel %vm774_vm12, %v743_v46, 0.0 }
 0x260   : > { %v548_v2 = vpop.f32.mrf.mxu3  ;;  %779 = vadd.xlane.f32.xlu1 %v778_v47 }
 0x261   : > { %v727_v48 = vsub.f32 %v2240_v27, %v548_v2  ;;  %v2436_v45 = vpop.f32.mrf.mxu2 }
 0x262   : > { %v503_v49 = vpop.f32.mrf.mxu0 }
 0x263   : > { %v759_v50 = vmul.f32 %v727_v48, %v727_v48  ;;  %v712_v51 = vsub.f32 %v2144_v6, %v503_v49 }
 0x265   : > { %v826_v57 = vsel %vm774_vm12, %v759_v50, 0.0  ;;  %v744_v52 = vmul.f32 %v712_v51, %v712_v51 }
 0x267   : > { %v781_v56 = vsel %vm774_vm12, %v744_v52, 0.0 }
 0x268   : > { %v551_v25 = vpop.f32.mrf.mxu3  ;;  %827 = vadd.xlane.f32.xlu1 %v826_v57 }
 0x269   : > { %v728_v26 = vsub.f32 %v2245_v28, %v551_v25  ;;  %v2441_v54 = vpop.f32.mrf.mxu2 }
 0x26a   : > { %v506_v3 = vpop.f32.mrf.mxu0 }
 0x26b   : > { %v760_v53 = vmul.f32 %v728_v26, %v728_v26  ;;  %v713_v55 = vsub.f32 %v2149_v7, %v506_v3 }
 0x26d   : > { %v829_v27 = vsel %vm774_vm12, %v760_v53, 0.0  ;;  %v745_v6 = vmul.f32 %v713_v55, %v713_v55 }
 0x26e   : > { %830 = vadd.xlane.f32.xlu2 %v829_v27 }
 0x26f   : > { %v784_v63 = vsel %vm774_vm12, %v745_v6, 0.0 }
 0x270   : > { %v554_v58 = vpop.f32.mrf.mxu3  ;;  %782 = vadd.xlane.f32.xlu1 %v781_v56 }
 0x271   : > { %v729_v59 = vsub.f32 %v2250_v29, %v554_v58  ;;  %v2447_v28 = vpop.f32.mrf.mxu2 }
 0x272   : > { %v509_v60 = vpop.f32.mrf.mxu0 }
 0x273   : > { %v761_v61 = vmul.f32 %v729_v59, %v729_v59  ;;  %v714_v62 = vsub.f32 %v2154_v8, %v509_v60 }
 0x275   : > { %v832_v7 = vsel %vm774_vm12, %v761_v61, 0.0  ;;  %v746_v4 = vmul.f32 %v714_v62, %v714_v62 }
 0x276   : > { %785 = vadd.xlane.f32.xlu2 %v784_v63 }
 0x277   : > { %v787_v24 = vsel %vm774_vm12, %v746_v4, 0.0 }
 0x278   : > { %v557_v0 = vpop.f32.mrf.mxu3  ;;  %833 = vadd.xlane.f32.xlu1 %v832_v7 }
 0x279   : > { %v730_v17 = vsub.f32 %v2255_v30, %v557_v0  ;;  %v2455_v42 = vpop.f32.mrf.mxu2 }
 0x27a   : > { %v512_v5 = vpop.f32.mrf.mxu0 }
 0x27b   : > { %v715_v16 = vsub.f32 %v2162_v10, %v512_v5  ;;  %v762_v44 = vmul.f32 %v730_v17, %v730_v17 }
 0x27d   : > { %v747_v29 = vmul.f32 %v715_v16, %v715_v16  ;;  %v835_v10 = vsel %vm774_vm12, %v762_v44, 0.0 }
 0x27e   : > { %788 = vadd.xlane.f32.xlu2 %v787_v24 }
 0x27f   : > { %v790_v8 = vsel %vm774_vm12, %v747_v29, 0.0 }
 0x280   : > { %v560_v43 = vpop.f32.mrf.mxu3  ;;  %791 = vadd.xlane.f32.xlu1 %v790_v8 }
 0x281   : > { %v731_v46 = vsub.f32 %v2260_v31, %v560_v43  ;;  %v2462_v50 = vpop.f32.mrf.mxu2 }
 0x282   : > { %v515_v47 = vpop.f32.mrf.mxu0 }
 0x283   : > { %v763_v2 = vmul.f32 %v731_v46, %v731_v46  ;;  %v716_v48 = vsub.f32 %v2167_v11, %v515_v47 }
 0x285   : > { %v838_v30 = vsel %vm774_vm12, %v763_v2, 0.0  ;;  %v748_v51 = vmul.f32 %v716_v48, %v716_v48 }
 0x286   : > { %836 = vadd.xlane.f32.xlu2 %v835_v10 }
 0x287   : > { %v793_v3 = vsel %vm774_vm12, %v748_v51, 0.0 }
 0x288   : > { %v563_v49 = vpop.f32.mrf.mxu3  ;;  %839 = vadd.xlane.f32.xlu1 %v838_v30 }
 0x289   : > { %v732_v26 = vsub.f32 %v2265_v32, %v563_v49  ;;  %v2469_v56 = vpop.f32.mrf.mxu2 }
 0x28a   : > { %v518_v57 = vpop.f32.mrf.mxu0 }
 0x28b   : > { %v717_v25 = vsub.f32 %v2172_v12, %v518_v57  ;;  %v764_v53 = vmul.f32 %v732_v26, %v732_v26 }
 0x28d   : > { %v749_v31 = vmul.f32 %v717_v25, %v717_v25  ;;  %v841_v12 = vsel %vm774_vm12, %v764_v53, 0.0 }
 0x28e   : > { %794 = vadd.xlane.f32.xlu2 %v793_v3 }
 0x28f   : > { %v796_v11 = vsel %vm774_vm12, %v749_v31, 0.0  ;;  %v2494_v31 = vpop.f32.mrf.mxu1 }
 0x290   : > { %v566_v52 = vpop.f32.mrf.mxu3  ;;  %797 = vadd.xlane.f32.xlu1 %v796_v11 }
 0x291   : > { %v733_v55 = vsub.f32 %v2270_v33, %v566_v52  ;;  %v2475_v62 = vpop.f32.mrf.mxu2 }
 0x292   : > { %v521_v27 = vpop.f32.mrf.mxu0 }
 0x293   : > { %v765_v58 = vmul.f32 %v733_v55, %v733_v55  ;;  %v718_v6 = vsub.f32 %v2177_v13, %v521_v27 }
 0x295   : > { %v844_v32 = vsel %vm774_vm12, %v765_v58, 0.0  ;;  %v750_v59 = vmul.f32 %v718_v6, %v718_v6 }
 0x296   : > { %842 = vadd.xlane.f32.xlu2 %v841_v12 }
 0x297   : > { %v799_v33 = vsel %vm774_vm12, %v750_v59, 0.0  ;;  %v2503_v58 = vpop.f32.mrf.mxu1 }
 0x298   : > { %845 = vadd.xlane.f32.xlu1 %v844_v32  ;;  %v569_v7 = vpop.f32.mrf.mxu3 }
 0x299   : > { %v2480_v16 = vpop.f32.mrf.mxu2 }
 0x29a   : > { %v524_v60 = vpop.f32.mrf.mxu0 }
 0x29b   : > { %v719_v61 = vsub.f32 %v2182_v14, %v524_v60 }
 0x29d   : > { %v751_v63 = vmul.f32 %v719_v61, %v719_v61 }
 0x29e   : > { %800 = vadd.xlane.f32.xlu2 %v799_v33 }
 0x29f   : > { %v802_v0 = vsel %vm774_vm12, %v751_v63, 0.0 }
 0x2a0   : > { %803 = vadd.xlane.f32.xlu1 %v802_v0  ;;  %v572_v29 = vpop.f32.mrf.mxu3 }
 0x2a1   : > { %v2485_v44 = vpop.f32.mrf.mxu2 }
 0x2a2   : > { %v527_v13 = vpop.f32.mrf.mxu0 }
 0x2a3   : > { %v720_v4 = vsub.f32 %v2187_v15, %v527_v13 }
 0x2a5   : > { %v752_v5 = vmul.f32 %v720_v4, %v720_v4  ;;  %v734_v4 = vsub.f32 %v2275_v34, %v569_v7 }
 0x2a7   : > { %v805_v17 = vsel %vm774_vm12, %v752_v5, 0.0 }
 0x2a8   : > { %806 = vadd.xlane.f32.xlu2 %v805_v17  ;;  %v575_v46 = vpop.f32.mrf.mxu3 }
 0x2a9   : > { %v2490_v49 = vpop.f32.mrf.mxu2 }
 0x2aa   : > { %v530_v14 = vpop.f32.mrf.mxu0 }
 0x2ab   : > { %v721_v24 = vsub.f32 %v2202_v18, %v530_v14 }
 0x2ad   : > { %v753_v8 = vmul.f32 %v721_v24, %v721_v24 }
 0x2af   : > { %v808_v43 = vsel %vm774_vm12, %v753_v8, 0.0  ;;  %v766_v8 = vmul.f32 %v734_v4, %v734_v4 }
 0x2b0   : > { %809 = vadd.xlane.f32.xlu1 %v808_v43  ;;  %v578_v18 = vpop.f32.mrf.mxu3 }
 0x2b1   : > { %v2496_v3 = vpop.f32.mrf.mxu2  ;;  %v847_v7 = vsel %vm774_vm12, %v766_v8, 0.0 }
 0x2b2   : > { %v533_v47 = vpop.f32.mrf.mxu0 }
 0x2b3   : > { %v722_v15 = vsub.f32 %v2207_v19, %v533_v47 }
 0x2b5   : > { %v754_v2 = vmul.f32 %v722_v15, %v722_v15 }
 0x2b7   : > { %v811_v48 = vsel %vm774_vm12, %v754_v2, 0.0 }
 0x2b8   : > { %812 = vadd.xlane.f32.xlu2 %v811_v48  ;;  %v581_v11 = vpop.f32.mrf.mxu3  ;;  %v736_v48 = vsub.f32 %v2285_v36, %v575_v46 }
 0x2b9   : > { %v2507_v12 = vpop.f32.mrf.mxu2 }
 0x2ba   : > { %v536_v10 = vpop.f32.mrf.mxu0 }
 0x2bb   : > { %v723_v30 = vsub.f32 %v2212_v20, %v536_v10 }
 0x2bd   : > { %v755_v51 = vmul.f32 %v723_v30, %v723_v30 }
 0x2bf   : > { %v814_v57 = vsel %vm774_vm12, %v755_v51, 0.0 }
 0x2c0   : > { %815 = vadd.xlane.f32.xlu1 %v814_v57  ;;  %v584_v32 = vpop.f32.mrf.mxu3 }
 0x2c1   : > { %v739_v10 = vsub.f32 %v2300_v39, %v584_v32 }
 0x2c2   : > { %v539_v25 = vpop.f32.mrf.mxu0 }
 0x2c3   : > { %v724_v26 = vsub.f32 %v2217_v21, %v539_v25  ;;  %v735_v21 = vsub.f32 %v2280_v35, %v572_v29  ;;  %v737_v35 = vsub.f32 %v2290_v37, %v578_v18  ;;  %v2515_v29 = vpop.f32.mrf.mxu1 }
 0x2c5   : > { %v756_v19 = vmul.f32 %v724_v26, %v724_v26  ;;  %v767_v61 = vmul.f32 %v735_v21, %v735_v21  ;;  %v769_v47 = vmul.f32 %v737_v35, %v737_v35  ;;  %v738_v21 = vsub.f32 %v2295_v38, %v581_v11 }
 0x2c7   : > { %v817_v52 = vsel %vm774_vm12, %v756_v19, 0.0  ;;  %v850_v5 = vsel %vm774_vm12, %v767_v61, 0.0  ;;  %v856_v18 = vsel %vm774_vm12, %v769_v47, 0.0  ;;  %v768_v19 = vmul.f32 %v736_v48, %v736_v48 }
 0x2c8   : > { %818 = vadd.xlane.f32.xlu2 %v817_v52  ;;  %v587_v43 = vpop.f32.mrf.mxu3  ;;  %v771_v52 = vmul.f32 %v739_v10, %v739_v10  ;;  %v770_v38 = vmul.f32 %v738_v21, %v738_v21 }
 0x2ca   : > { %v542_v20 = vpop.f32.mrf.mxu0  ;;  %v859_v47 = vsel %vm774_vm12, %v770_v38, 0.0 }
 0x2cb   : > { %v725_v53 = vsub.f32 %v2222_v22, %v542_v20  ;;  %v2500_v55 = vpop.xlane.xlu0 %776  ;;  %v2527_v26 = vpop.f32.mrf.mxu1 }
 0x2cc   : > { %1957 = vrsqrt.f32 %v2500_v55  ;;  %vm878_vm14 = vcmp.eq.f32.partialorder %v2500_v55, inf  ;;  %v881_v11 = vand.u32 2147483648, %v2500_v55  ;;  %vm880_vm0 = vcmp.eq.f32.partialorder %v2500_v55, 0.0 }
 0x2cd   : > { %v757_v27 = vmul.f32 %v725_v53, %v725_v53 }
 0x2cf   : > { %v820_v6 = vsel %vm774_vm12, %v757_v27, 0.0 }
 0x2d0   : > { %821 = vadd.xlane.f32.xlu1 %v820_v6  ;;  %v590_v36 = vpop.f32.mrf.mxu3 }
 0x2d1   : > { %v741_v6 = vsub.f32 %v2310_v41, %v590_v36 }
 0x2d2   : > { %v1958_v59 = vpop.eup %1957  ;;  %v545_v60 = vpop.f32.mrf.mxu0 }
 0x2d3   : > { %v872_v22 = vmul.f32 %v1958_v59, %v2500_v55  ;;  %v726_v63 = vsub.f32 %v2227_v23, %v545_v60  ;;  %v780_v33 = vpop.xlane.xlu1 %779  ;;  %v2517_v23 = vpop.f32.mrf.mxu2  ;;  %v853_v60 = vsel %vm774_vm12, %v768_v19, 0.0 }
 0x2d4   : > { %1959 = vrsqrt.f32 %v780_v33  ;;  %vm890_vm13 = vcmp.eq.f32.partialorder %v780_v33, inf  ;;  %v893_v61 = vand.u32 2147483648, %v780_v33  ;;  %vm892_vm15 = vcmp.eq.f32.partialorder %v780_v33, 0.0 }
 0x2d5   : > { %v873_v0 = vmul.f32 %v1958_v59, %v872_v22  ;;  %v758_v13 = vmul.f32 %v726_v63, %v726_v63 }
 0x2d7   : > { %v823_v17 = vsel %vm774_vm12, %v758_v13, 0.0  ;;  %v874_v14 = vmul.f32 0.5, %v873_v0  ;;  %v773_v13 = vmul.f32 %v741_v6, %v741_v6  ;;  %v2089_v6 = vmov 0.0  }
 0x2d8   : > { %851 = vadd.xlane.f32.xlu1 %v850_v5  ;;  %824 = vadd.xlane.f32.xlu2 %v823_v17  ;;  %313 = vst.msk [vmem:[#allocation4] sm:$0x1] %vm312_vm8, %v2089_v6 }
 0x2d9   : > { %v875_v34 = vsub.f32 1.5, %v874_v14  ;;  %v2550_v14 = vpop.f32.mrf.mxu1 }
 0x2da   : > { %v1960_v24 = vpop.eup %1959 }
 0x2db   : > { %v884_v15 = vmul.f32 %v1960_v24, %v780_v33  ;;  %v2519_v2 = vpop.xlane.xlu1 %827  ;;  %v876_v51 = vmul.f32 %v1958_v59, %v875_v34  ;;  %v2531_v27 = vpop.f32.mrf.mxu2  ;;  %v862_v59 = vsel %vm774_vm12, %v771_v52, 0.0  ;;  %v868_v34 = vsel %vm774_vm12, %v773_v13, 0.0 }
 0x2dd   : > { %v885_v37 = vmul.f32 %v1960_v24, %v884_v15  ;;  %v877_v39 = vmul.f32 %v876_v51, %v2500_v55 }
 0x2df   : > { %v886_v30 = vmul.f32 0.5, %v885_v37  ;;  %v879_v22 = vsel %vm878_vm14, %v2500_v55, %v877_v39  ;;  %v1506_v37 = vand.u32 127, %v164_v1 }
 0x2e0   : > { %857 = vadd.xlane.f32.xlu1 %v856_v18  ;;  %848 = vadd.xlane.f32.xlu2 %v847_v7  ;;  %v882_v5 = vsel %vm880_vm0, %v881_v11, %v879_v22 }
 0x2e1   : > { %v887_v57 = vsub.f32 1.5, %v886_v30  ;;  %v2525_v25 = vpop.xlane.xlu2 %830  ;;  %v1782_v15 = vadd.f32 -1.0, %v882_v5  ;;  %vm1507_vm1 = vcmp.eq.s32.totalorder %v2157_v9, %v1506_v37 }
 0x2e2   : > { %vm1094_vm14 = vcmp.eq.f32.partialorder %v2525_v25, inf  ;;  %vm1096_vm0 = vcmp.eq.f32.partialorder %v2525_v25, 0.0 }
 0x2e3   : > { %v888_v20 = vmul.f32 %v1960_v24, %v887_v57  ;;  %v2529_v53 = vpop.xlane.xlu1 %782  ;;  %v740_v24 = vsub.f32 %v2305_v40, %v587_v43  ;;  %v2553_v8 = vpop.f32.mrf.mxu2  ;;  %v1287_v51 = vmax.f32 %v1782_v15, 0.0 }
 0x2e4   : > { %1961 = vrsqrt.f32 %v2529_v53  ;;  %vm902_vm2 = vcmp.eq.f32.partialorder %v2529_v53, inf  ;;  %v905_v39 = vand.u32 2147483648, %v2529_v53  ;;  %vm904_vm3 = vcmp.eq.f32.partialorder %v2529_v53, 0.0 }
 0x2e5   : > { %v889_v46 = vmul.f32 %v888_v20, %v780_v33  ;;  %v772_v43 = vmul.f32 %v740_v24, %v740_v24 }
 0x2e7   : > { %v891_v32 = vsel %vm890_vm13, %v780_v33, %v889_v46  ;;  %vm1082_vm13 = vcmp.eq.f32.partialorder %v2519_v2, inf }
 0x2e8   : > { %863 = vadd.xlane.f32.xlu1 %v862_v59  ;;  %854 = vadd.xlane.f32.xlu2 %v853_v60  ;;  %v894_v41 = vsel %vm892_vm15, %v893_v61, %v891_v32  ;;  %v2577_v32 = vsel %vm1507_vm1, 1.0, %v2089_v6  ;;  %v1320_v59 = vmul.f32 %v1287_v51, %v1287_v51  ;;  %v865_v61 = vsel %vm774_vm12, %v772_v43, 0.0 }
 0x2e9   : > { %v2541_v63 = vpop.xlane.xlu2 %785  ;;  %v1783_v33 = vadd.f32 -1.0, %v894_v41  ;;  %vm1084_vm15 = vcmp.eq.f32.partialorder %v2519_v2, 0.0 }
 0x2ea   : > { %v1962_v0 = vpop.eup %1961  ;;  %1963 = vrsqrt.f32 %v2541_v63  ;;  %vm914_vm6 = vcmp.eq.f32.partialorder %v2541_v63, inf  ;;  %vm916_vm7 = vcmp.eq.f32.partialorder %v2541_v63, 0.0 }
 0x2eb   : > { %v896_v4 = vmul.f32 %v1962_v0, %v2529_v53  ;;  %v2547_v35 = vpop.xlane.xlu1 %833  ;;  %1965 = vrsqrt.f32 %v2519_v2  ;;  %v1288_v48 = vmax.f32 %v1783_v33, 0.0  ;;  %v2574_v21 = vpop.f32.mrf.mxu2 }
 0x2ec   : > { %1967 = vrsqrt.f32 %v2525_v25  ;;  %v1510_v5 = vmul.f32 %v2577_v32, %v2574_v21 }
 0x2ed   : > { %v897_v17 = vmul.f32 %v1962_v0, %v896_v4  ;;  %v1321_v52 = vmul.f32 %v1288_v48, %v1288_v48  ;;  %v917_v48 = vand.u32 2147483648, %v2541_v63 }
 0x2ef   : > { %v898_v55 = vmul.f32 0.5, %v897_v17  ;;  %v1353_v41 = vmul.f32 %v1321_v52, %v2503_v58 }
 0x2f0   : > { %v1964_v7 = vpop.eup %1963  ;;  %869 = vadd.xlane.f32.xlu1 %v868_v34  ;;  %860 = vadd.xlane.f32.xlu2 %v859_v47  ;;  %v1352_v47 = vmul.f32 %v1320_v59, %v2494_v31  ;;  %v2605_v31 = vsel %vm1511_vm5, %v1510_v5, 0.0 }
 0x2f1   : > { %v899_v10 = vsub.f32 1.5, %v898_v55  ;;  %v2559_v30 = vpop.xlane.xlu2 %788  ;;  %v2561_v40 = vpop.eup %1965  ;;  %v908_v18 = vmul.f32 %v1964_v7, %v2541_v63 }
 0x2f2   : > { %1969 = vrsqrt.f32 %v2559_v30  ;;  %v1076_v20 = vmul.f32 %v2561_v40, %v2519_v2  ;;  %v2579_v9 = vpop.eup %1967  ;;  %v1385_v52 = vsel %vm1384_vm4, %v1352_v47, 0.0  ;;  %vm926_vm9 = vcmp.eq.f32.partialorder %v2559_v30, inf }
 0x2f3   : > { %v900_v57 = vmul.f32 %v1962_v0, %v899_v10  ;;  %v2565_v19 = vpop.xlane.xlu1 %791  ;;  %v909_v1 = vmul.f32 %v1964_v7, %v908_v18  ;;  %v2584_v0 = vpop.f32.mrf.mxu1  ;;  %v1088_v15 = vmul.f32 %v2579_v9, %v2525_v25  ;;  %v1386_v10 = vsel %vm1384_vm4, %v1353_v41, 0.0 }
 0x2f4   : > { %1971 = vrsqrt.f32 %v2565_v19  ;;  %v1077_v33 = vmul.f32 %v2561_v40, %v1076_v20  ;;  %vm928_vm10 = vcmp.eq.f32.partialorder %v2559_v30, 0.0  ;;  %vm938_vm11 = vcmp.eq.f32.partialorder %v2565_v19, inf }
 0x2f5   : > { %v901_v36 = vmul.f32 %v900_v57, %v2529_v53  ;;  %v910_v46 = vmul.f32 0.5, %v909_v1  ;;  %1973 = vrsqrt.f32 %v2547_v35  ;;  %v1089_v20 = vmul.f32 %v2579_v9, %v1088_v15 }
 0x2f6   : > { %vm940_vm12 = vcmp.eq.f32.partialorder %v2565_v19, 0.0 }
 0x2f7   : > { %v903_v60 = vsel %vm902_vm2, %v2529_v53, %v901_v36  ;;  %v911_v11 = vsub.f32 1.5, %v910_v46  ;;  %v1387_v46 = vadd.f32 %v1386_v10, %v1385_v52  ;;  %v1090_v47 = vmul.f32 0.5, %v1089_v20 }
 0x2f8   : > { %v1970_v22 = vpop.eup %1969  ;;  %v906_v38 = vsel %vm904_vm3, %v905_v39, %v903_v60  ;;  %866 = vadd.xlane.f32.xlu2 %v865_v61  ;;  %vm1106_vm2 = vcmp.eq.f32.partialorder %v2547_v35, inf  ;;  %vm1108_vm3 = vcmp.eq.f32.partialorder %v2547_v35, 0.0 }
 0x2f9   : > { %v1784_v13 = vadd.f32 -1.0, %v906_v38  ;;  %v2588_v4 = vpop.xlane.xlu2 %836  ;;  %v912_v17 = vmul.f32 %v1964_v7, %v911_v11  ;;  %v920_v24 = vmul.f32 %v1970_v22, %v2559_v30  ;;  %v1078_v38 = vmul.f32 0.5, %v1077_v33 }
 0x2fa   : > { %v1972_v53 = vpop.eup %1971  ;;  %1975 = vrsqrt.f32 %v2588_v4 }
 0x2fb   : > { %v1289_v55 = vmax.f32 %v1784_v13, 0.0  ;;  %v932_v58 = vmul.f32 %v1972_v53, %v2565_v19  ;;  %v2598_v34 = vpop.xlane.xlu1 %839  ;;  %v913_v37 = vmul.f32 %v912_v17, %v2541_v63  ;;  %v921_v7 = vmul.f32 %v1970_v22, %v920_v24  ;;  %v2607_v51 = vpop.eup %1973 }
 0x2fc   : > { %v2621_v13 = vpop.f32.mrf.mxu1 }
 0x2fd   : > { %v1322_v43 = vmul.f32 %v1289_v55, %v1289_v55  ;;  %v933_v18 = vmul.f32 %v1972_v53, %v932_v58  ;;  %v915_v57 = vsel %vm914_vm6, %v2541_v63, %v913_v37  ;;  %v922_v1 = vmul.f32 0.5, %v921_v7 }
 0x2fe   : > { %v918_v39 = vsel %vm916_vm7, %v917_v48, %v915_v57  ;;  %v1100_v63 = vmul.f32 %v2607_v51, %v2547_v35  ;;  %v1079_v37 = vsub.f32 1.5, %v1078_v38  ;;  %v929_v7 = vand.u32 2147483648, %v2559_v30 }
 0x2ff   : > { %v1354_v36 = vmul.f32 %v1322_v43, %v2515_v29  ;;  %v1785_v59 = vadd.f32 -1.0, %v918_v39  ;;  %v923_v60 = vsub.f32 1.5, %v922_v1  ;;  %v934_v61 = vmul.f32 0.5, %v933_v18 }
 0x300   : > { %1513 = vadd.xlane.f32.xlu2 %v2605_v31  ;;  %v1101_v48 = vmul.f32 %v2607_v51, %v1100_v63  ;;  %v2635_v43 = vpop.eup %1975  ;;  %v1091_v18 = vsub.f32 1.5, %v1090_v47  ;;  %v941_v1 = vand.u32 2147483648, %v2565_v19  ;;  %vm1118_vm6 = vcmp.eq.f32.partialorder %v2588_v4, inf }
 0x301   : > { %v1388_v11 = vsel %vm1384_vm4, %v1354_v36, 0.0  ;;  %v2619_v41 = vpop.xlane.xlu2 %794  ;;  %v1290_v5 = vmax.f32 %v1785_v59, 0.0  ;;  %v924_v17 = vmul.f32 %v1970_v22, %v923_v60  ;;  %v935_v24 = vsub.f32 1.5, %v934_v61 }
 0x302   : > { %v1389_v29 = vadd.f32 %v1388_v11, %v1387_v46  ;;  %v1102_v39 = vmul.f32 0.5, %v1101_v48  ;;  %v1112_v38 = vmul.f32 %v2635_v43, %v2588_v4  ;;  %1977 = vrsqrt.f32 %v2619_v41 }
 0x303   : > { %v1323_v15 = vmul.f32 %v1290_v5, %v1290_v5  ;;  %v925_v33 = vmul.f32 %v924_v17, %v2559_v30  ;;  %v936_v55 = vmul.f32 %v1972_v53, %v935_v24  ;;  %v2626_v58 = vpop.xlane.xlu1 %797  ;;  %v1092_v11 = vmul.f32 %v2579_v9, %v1091_v18 }
 0x304   : > { %v2649_v63 = vpop.f32.mrf.mxu1  ;;  %v1103_v17 = vsub.f32 1.5, %v1102_v39  ;;  %1979 = vrsqrt.f32 %v2598_v34  ;;  %v1113_v47 = vmul.f32 %v2635_v43, %v1112_v38  ;;  %v1085_v18 = vand.u32 2147483648, %v2519_v2 }
 0x305   : > { %v1355_v22 = vmul.f32 %v1323_v15, %v2527_v26  ;;  %v927_v10 = vsel %vm926_vm9, %v2559_v30, %v925_v33  ;;  %v937_v53 = vmul.f32 %v936_v55, %v2565_v19  ;;  %v1080_v26 = vmul.f32 %v2561_v40, %v1079_v37 }
 0x306   : > { %v930_v57 = vsel %vm928_vm10, %v929_v7, %v927_v10  ;;  %v1093_v33 = vmul.f32 %v1092_v11, %v2525_v25  ;;  %v1104_v48 = vmul.f32 %v2607_v51, %v1103_v17  ;;  %1981 = vrsqrt.f32 %v2626_v58 }
 0x307   : > { %v1390_v52 = vsel %vm1384_vm4, %v1355_v22, 0.0  ;;  %v1786_v20 = vadd.f32 -1.0, %v930_v57  ;;  %v939_v36 = vsel %vm938_vm11, %v2565_v19, %v937_v53  ;;  %v1081_v40 = vmul.f32 %v1080_v26, %v2519_v2 }
 0x308   : > { %v1391_v30 = vadd.f32 %v1390_v52, %v1389_v29  ;;  %v942_v46 = vsel %vm940_vm12, %v941_v1, %v939_v36  ;;  %v2658_v55 = vpop.eup %1977  ;;  %v1114_v10 = vmul.f32 0.5, %v1113_v47  ;;  %v1465_v1 = vld [vmem:[#allocation3] sm:$0xf]  ;;  %v1105_v26 = vmul.f32 %v1104_v48, %v2547_v35 }
 0x309   : > { %v2643_v59 = vpop.xlane.xlu2 %842  ;;  %v1291_v60 = vmax.f32 %v1786_v20, 0.0  ;;  %v1787_v61 = vadd.f32 -1.0, %v942_v46  ;;  %v944_v51 = vmul.f32 %v2658_v55, %v2619_v41  ;;  %v1097_v20 = vand.u32 2147483648, %v2525_v25 }
 0x30a   : > { %v2668_v53 = vpop.eup %1979  ;;  %vm1466_vm1 = vcmp.gt.f32.partialorder %v1465_v1, 0.0  ;;  %v1107_v17 = vsel %vm1106_vm2, %v2547_v35, %v1105_v26  ;;  %v1515_v47 = vrot.slane %v2605_v31, 4  ;;  %vm1120_vm7 = vcmp.eq.f32.partialorder %v2588_v4, 0.0 }
 0x30b   : > { %v1324_v5 = vmul.f32 %v1291_v60, %v1291_v60  ;;  %v1292_v19 = vmax.f32 %v1787_v61, 0.0  ;;  %v2655_v15 = vpop.xlane.xlu1 %845  ;;  %v1115_v60 = vsub.f32 1.5, %v1114_v10  ;;  %v1124_v61 = vmul.f32 %v2668_v53, %v2598_v34 }
 0x30c   : > { %v2682_v39 = vpop.f32.mrf.mxu1  ;;  %v2686_v38 = vpop.eup %1981  ;;  %v2690_v11 = vsel %vm1466_vm1, 1.0, %v2089_v6  ;;  %vm1130_vm9 = vcmp.eq.f32.partialorder %v2598_v34, inf  ;;  %vm950_vm10 = vcmp.eq.f32.partialorder %v2619_v41, inf  ;;  %vm952_vm11 = vcmp.eq.f32.partialorder %v2619_v41, 0.0 }
 0x30d   : > { %v1356_v29 = vmul.f32 %v1324_v5, %v2550_v14  ;;  %v1325_v24 = vmul.f32 %v1292_v19, %v1292_v19  ;;  %v1083_v14 = vsel %vm1082_vm13, %v2519_v2, %v1081_v40  ;;  %v945_v2 = vmul.f32 %v2658_v55, %v944_v51 }
 0x30e   : > { %v1086_v36 = vsel %vm1084_vm15, %v1085_v18, %v1083_v14  ;;  %v1109_v40 = vand.u32 2147483648, %v2547_v35  ;;  %v956_v6 = vmul.f32 %v2686_v38, %v2626_v58  ;;  %v1516_v18 = vadd.f32 %v1515_v47, %v2605_v31 }
 0x30f   : > { %v1392_v9 = vsel %vm1384_vm4, %v1356_v29, 0.0  ;;  %v1357_v37 = vmul.f32 %v1325_v24, %v2584_v0  ;;  %v1095_v0 = vsel %vm1094_vm14, %v2525_v25, %v1093_v33  ;;  %v1799_v25 = vadd.f32 -1.0, %v1086_v36 }
 0x310   : > { %v1393_v7 = vadd.f32 %v1392_v9, %v1391_v30  ;;  %v2090_v30 = vmov 0   ;;  %v1098_v46 = vsel %vm1096_vm0, %v1097_v20, %v1095_v0  ;;  %v1116_v29 = vmul.f32 %v2635_v43, %v1115_v60 }
 0x311   : > { %v1394_v22 = vsel %vm1384_vm4, %v1357_v37, 0.0  ;;  %v2676_v52 = vpop.xlane.xlu2 %800  ;;  %1955 = vset.pattern.permute.xlu1 %v2090_v30  ;;  %1956 = vset.pattern.permute.xlu0 %v2090_v30  ;;  %v1800_v19 = vadd.f32 -1.0, %v1098_v46  ;;  %v1125_v24 = vmul.f32 %v2668_v53, %v1124_v61  ;;  %v946_v33 = vmul.f32 0.5, %v945_v2 }
 0x312   : > { %v2672_v57 = vadd.f32 %v1394_v22, %v1393_v7  ;;  %1523 = vperm.xlu1 %1955, %v2690_v11   ;;  %1983 = vrsqrt.f32 %v2676_v52  ;;  %v1304_v37 = vmax.f32 %v1799_v25, 0.0  ;;  %v1110_v48 = vsel %vm1108_vm3, %v1109_v40, %v1107_v17 }
 0x313   : > { %v2695_v5 = vpop.xlane.xlu1 %803  ;;  %v1305_v7 = vmax.f32 %v1800_v19, 0.0  ;;  %v1117_v14 = vmul.f32 %v1116_v29, %v2588_v4  ;;  %v1126_v22 = vmul.f32 0.5, %v1125_v24  ;;  %v957_v35 = vmul.f32 %v2686_v38, %v956_v6 }
 0x314   : > { %1985 = vrsqrt.f32 %v2695_v5  ;;  %v1801_v10 = vadd.f32 -1.0, %v1110_v48  ;;  %v947_v0 = vsub.f32 1.5, %v946_v33  ;;  %v2716_v51 = vpop.f32.mrf.mxu1  ;;  %v1337_v1 = vmul.f32 %v1304_v37, %v1304_v37 }
 0x315   : > { %1987 = vrsqrt.f32 %v2643_v59  ;;  %v1338_v26 = vmul.f32 %v1305_v7, %v1305_v7  ;;  %v1119_v46 = vsel %vm1118_vm6, %v2588_v4, %v1117_v14  ;;  %v1127_v60 = vsub.f32 1.5, %v1126_v22 }
 0x316   : > { %v958_v61 = vmul.f32 0.5, %v957_v35  ;;  %v1306_v31 = vmax.f32 %v1801_v10, 0.0  ;;  %v1121_v25 = vand.u32 2147483648, %v2588_v4  ;;  %v1517_v19 = vrot.slane %v1516_v18, 2 }
 0x317   : > { %v948_v17 = vmul.f32 %v2658_v55, %v947_v0  ;;  %v1369_v24 = vmul.f32 %v1337_v1, %v2436_v45  ;;  %v1370_v33 = vmul.f32 %v1338_v26, %v2441_v54  ;;  %v1128_v55 = vmul.f32 %v2668_v53, %v1127_v60 }
 0x318   : > { %v2710_v43 = vpop.eup %1983  ;;  %v1122_v37 = vsel %vm1120_vm7, %v1121_v25, %v1119_v46  ;;  %v959_v7 = vsub.f32 1.5, %v958_v61  ;;  %v1339_v45 = vmul.f32 %v1306_v31, %v1306_v31  ;;  %v1518_v4 = vadd.f32 %v1517_v19, %v1516_v18 }
 0x319   : > { %v968_v20 = vmul.f32 %v2710_v43, %v2676_v52  ;;  %v949_v22 = vmul.f32 %v948_v17, %v2619_v41  ;;  %v2750_v54 = vsel %vm1384_vm4, %v1369_v24, 0.0  ;;  %v2753_v10 = vmul.f32 2.0, %v2574_v21 }
 0x31a   : > { %v2720_v36 = vpop.eup %1985  ;;  %v2757_v1 = vsel %vm1384_vm4, %v1370_v33, 0.0  ;;  %v1129_v46 = vmul.f32 %v1128_v55, %v2598_v34  ;;  %v960_v21 = vmul.f32 %v2686_v38, %v959_v7  ;;  %v1371_v61 = vmul.f32 %v1339_v45, %v2447_v28 }
 0x31b   : > { %v2706_v9 = vpop.xlane.xlu2 %806  ;;  %v2723_v30 = vpop.eup %1987  ;;  %v969_v6 = vmul.f32 %v2710_v43, %v968_v20  ;;  %v980_v47 = vmul.f32 %v2720_v36, %v2695_v5  ;;  %v1802_v20 = vadd.f32 -1.0, %v1122_v37  ;;  %v1519_v31 = vrot.slane %v1518_v4, 1 }
 0x31c   : > { %1989 = vrsqrt.f32 %v2706_v9  ;;  %v1136_v48 = vmul.f32 %v2723_v30, %v2643_v59  ;;  %v2761_v26 = vpop.f32.mrf.mxu1  ;;  %v951_v25 = vsel %vm950_vm10, %v2619_v41, %v949_v22  ;;  %v961_v7 = vmul.f32 %v960_v21, %v2626_v58 }
 0x31d   : > { %1991 = vrsqrt.f32 %v2655_v15  ;;  %v970_v53 = vmul.f32 0.5, %v969_v6  ;;  %v981_v0 = vmul.f32 %v2720_v36, %v980_v47  ;;  %v953_v6 = vand.u32 2147483648, %v2619_v41 }
 0x31e   : > { %v1137_v18 = vmul.f32 %v2723_v30, %v1136_v48  ;;  %v1307_v38 = vmax.f32 %v1802_v20, 0.0  ;;  %v1131_v48 = vsel %vm1130_vm9, %v2598_v34, %v1129_v46  ;;  %vm1132_vm12 = vcmp.eq.f32.partialorder %v2598_v34, 0.0 }
 0x31f   : > { %v971_v47 = vsub.f32 1.5, %v970_v53  ;;  %v982_v33 = vmul.f32 0.5, %v981_v0  ;;  %v954_v55 = vsel %vm952_vm11, %v953_v6, %v951_v25  ;;  %v1133_v45 = vand.u32 2147483648, %v2598_v34 }
 0x320   : > { %v1138_v37 = vmul.f32 0.5, %v1137_v18  ;;  %v2787_v41 = vsel %vm1384_vm4, %v1371_v61, 0.0  ;;  %v2789_v53 = vadd.f32 %v1519_v31, %v1518_v4  ;;  %v1788_v46 = vadd.f32 -1.0, %v954_v55 }
 0x321   : > { %v972_v0 = vmul.f32 %v2710_v43, %v971_v47  ;;  %v983_v20 = vsub.f32 1.5, %v982_v33  ;;  %v1134_v18 = vsel %vm1132_vm12, %v1133_v45, %v1131_v48  ;;  %vm962_vm13 = vcmp.eq.f32.partialorder %v2626_v58, inf }
 0x322   : > { %v2726_v2 = vpop.eup %1989  ;;  %v1139_v21 = vsub.f32 1.5, %v1138_v37  ;;  %v1340_v25 = vmul.f32 %v1307_v38, %v1307_v38  ;;  %v963_v34 = vsel %vm962_vm13, %v2626_v58, %v961_v7  ;;  %vm964_vm14 = vcmp.eq.f32.partialorder %v2626_v58, 0.0 }
 0x323   : > { %v2730_v40 = vpop.xlane.xlu1 %809  ;;  %v2732_v29 = vpop.eup %1991  ;;  %v992_v14 = vmul.f32 %v2726_v2, %v2706_v9  ;;  %v965_v61 = vand.u32 2147483648, %v2626_v58  ;;  %v2801_v33 = vadd.f32 -1.0, %v1134_v18  ;;  %vm1142_vm15 = vcmp.eq.f32.partialorder %v2643_v59, inf }
 0x324   : > { %1993 = vrsqrt.f32 %v2730_v40  ;;  %v1148_v35 = vmul.f32 %v2732_v29, %v2655_v15  ;;  %v2799_v47 = vpop.f32.mrf.mxu1  ;;  %v973_v38 = vmul.f32 %v972_v0, %v2676_v52  ;;  %v984_v37 = vmul.f32 %v2720_v36, %v983_v20 }
 0x325   : > { %v993_v60 = vmul.f32 %v2726_v2, %v992_v14  ;;  %v966_v58 = vsel %vm964_vm14, %v965_v61, %v963_v34  ;;  %v1140_v48 = vmul.f32 %v2723_v30, %v1139_v21  ;;  %v2809_v7 = vmul.f32 %v1340_v25, %v2455_v42 }
 0x326   : > { %v1149_v19 = vmul.f32 %v2732_v29, %v1148_v35  ;;  %vm1154_vm0 = vcmp.eq.f32.partialorder %v2655_v15, inf  ;;  %vm1144_vm1 = vcmp.eq.f32.partialorder %v2643_v59, 0.0  ;;  %vm974_vm2 = vcmp.eq.f32.partialorder %v2676_v52, inf }
 0x327   : > { %v994_v14 = vmul.f32 0.5, %v993_v60  ;;  %v1308_v30 = vmax.f32 %v2801_v33, 0.0  ;;  %v1789_v0 = vadd.f32 -1.0, %v966_v58  ;;  %v975_v42 = vsel %vm974_vm2, %v2676_v52, %v973_v38 }
 0x328   : > { %v1150_v22 = vmul.f32 0.5, %v1149_v19  ;;  %v985_v20 = vmul.f32 %v984_v37, %v2695_v5  ;;  %vm1156_vm3 = vcmp.eq.f32.partialorder %v2655_v15, 0.0  ;;  %vm976_vm6 = vcmp.eq.f32.partialorder %v2676_v52, 0.0 }
 0x329   : > { %v995_v19 = vsub.f32 1.5, %v994_v14  ;;  %v1145_v14 = vand.u32 2147483648, %v2643_v59  ;;  %vm986_vm7 = vcmp.eq.f32.partialorder %v2695_v5, inf  ;;  %vm988_vm9 = vcmp.eq.f32.partialorder %v2695_v5, 0.0 }
 0x32a   : > { %v2772_v24 = vpop.eup %1993  ;;  %v1151_v6 = vsub.f32 1.5, %v1150_v22  ;;  %v989_v38 = vand.u32 2147483648, %v2695_v5  ;;  %vm998_vm10 = vcmp.eq.f32.partialorder %v2706_v9, inf  ;;  %vm1000_vm11 = vcmp.eq.f32.partialorder %v2706_v9, 0.0 }
 0x32b   : > { %v2770_v17 = vpop.xlane.xlu2 %812  ;;  %v1004_v28 = vmul.f32 %v2772_v24, %v2730_v40  ;;  %v996_v45 = vmul.f32 %v2726_v2, %v995_v19  ;;  %v977_v2 = vand.u32 2147483648, %v2676_v52  ;;  %v987_v52 = vsel %vm986_vm7, %v2695_v5, %v985_v20 }
 0x32c   : > { %1995 = vrsqrt.f32 %v2770_v17  ;;  %v1152_v36 = vmul.f32 %v2732_v29, %v1151_v6  ;;  %v2840_v58 = vpop.f32.mrf.mxu1  ;;  %vm1010_vm12 = vcmp.eq.f32.partialorder %v2730_v40, inf  ;;  %vm1012_vm13 = vcmp.eq.f32.partialorder %v2730_v40, 0.0 }
 0x32d   : > { %v1005_v35 = vmul.f32 %v2772_v24, %v1004_v28  ;;  %v1293_v28 = vmax.f32 %v1788_v46, 0.0  ;;  %v1141_v46 = vmul.f32 %v1140_v48, %v2643_v59  ;;  %v997_v21 = vmul.f32 %v996_v45, %v2706_v9 }
 0x32e   : > { %v1153_v34 = vmul.f32 %v1152_v36, %v2655_v15  ;;  %v978_v19 = vsel %vm976_vm6, %v977_v2, %v975_v42  ;;  %v1001_v45 = vand.u32 2147483648, %v2706_v9  ;;  %vm1022_vm14 = vcmp.eq.f32.partialorder %v2770_v17, inf }
 0x32f   : > { %v1006_v4 = vmul.f32 0.5, %v1005_v35  ;;  %v1326_v18 = vmul.f32 %v1293_v28, %v1293_v28  ;;  %v1143_v28 = vsel %vm1142_vm15, %v2643_v59, %v1141_v46  ;;  %v1790_v48 = vadd.f32 -1.0, %v978_v19 }
 0x330   : > { %v1146_v20 = vsel %vm1144_vm1, %v1145_v14, %v1143_v28  ;;  %vm1024_vm15 = vcmp.eq.f32.partialorder %v2770_v17, 0.0 }
 0x331   : > { %v1007_v22 = vsub.f32 1.5, %v1006_v4  ;;  %v1358_v37 = vmul.f32 %v1326_v18, %v2621_v13  ;;  %v990_v13 = vsel %vm988_vm9, %v989_v38, %v987_v52  ;;  %v1157_v18 = vand.u32 2147483648, %v2655_v15 }
 0x332   : > { %v1996_v60 = vpop.eup %1995  ;;  %v2859_v59 = vadd.f32 -1.0, %v1146_v20  ;;  %v1013_v38 = vand.u32 2147483648, %v2730_v40 }
 0x333   : > { %v1016_v31 = vmul.f32 %v1996_v60, %v2770_v17  ;;  %v2797_v43 = vpop.xlane.xlu1 %815  ;;  %v1008_v61 = vmul.f32 %v2772_v24, %v1007_v22  ;;  %v1155_v22 = vsel %vm1154_vm0, %v2655_v15, %v1153_v34  ;;  %v1791_v34 = vadd.f32 -1.0, %v990_v13 }
 0x334   : > { %1997 = vrsqrt.f32 %v2797_v43  ;;  %v1158_v5 = vsel %vm1156_vm3, %v1157_v18, %v1155_v22  ;;  %v2876_v22 = vpop.f32.mrf.mxu1  ;;  %v1309_v13 = vmax.f32 %v2859_v59, 0.0  ;;  %vm1034_vm0 = vcmp.eq.f32.partialorder %v2797_v43, inf }
 0x335   : > { %v1017_v55 = vmul.f32 %v1996_v60, %v1016_v31  ;;  %v1294_v31 = vmax.f32 %v1789_v0, 0.0  ;;  %v1805_v15 = vadd.f32 -1.0, %v1158_v5  ;;  %vm1036_vm1 = vcmp.eq.f32.partialorder %v2797_v43, 0.0 }
 0x336   : > { %v1037_v59 = vand.u32 2147483648, %v2797_v43 }
 0x337   : > { %v1018_v35 = vmul.f32 0.5, %v1017_v55  ;;  %v999_v55 = vsel %vm998_vm10, %v2706_v9, %v997_v21  ;;  %v1327_v42 = vmul.f32 %v1294_v31, %v1294_v31  ;;  %v1310_v18 = vmax.f32 %v1805_v15, 0.0 }
 0x338   : > { %v1002_v46 = vsel %vm1000_vm11, %v1001_v45, %v999_v55  ;;  %v1025_v55 = vand.u32 2147483648, %v2770_v17 }
 0x339   : > { %v1019_v25 = vsub.f32 1.5, %v1018_v35  ;;  %v1009_v35 = vmul.f32 %v1008_v61, %v2730_v40  ;;  %v1359_v31 = vmul.f32 %v1327_v42, %v2649_v63  ;;  %v1792_v52 = vadd.f32 -1.0, %v1002_v46 }
 0x33a   : > { %v1998_v29 = vpop.eup %1997  ;;  %v1341_v63 = vmul.f32 %v1308_v30, %v1308_v30 }
 0x33b   : > { %v1028_v6 = vmul.f32 %v1998_v29, %v2797_v43  ;;  %v2830_v4 = vpop.xlane.xlu2 %818  ;;  %v1020_v36 = vmul.f32 %v1996_v60, %v1019_v25  ;;  %v1396_v60 = vsel %vm1384_vm4, %v1358_v37, 0.0  ;;  %v1295_v25 = vmax.f32 %v1790_v48, 0.0 }
 0x33c   : > { %1999 = vrsqrt.f32 %v2830_v4  ;;  %v1011_v14 = vsel %vm1010_vm12, %v2730_v40, %v1009_v35  ;;  %v1397_v40 = vadd.f32 %v1396_v60, %v2672_v57  ;;  %v1297_v35 = vmax.f32 %v1792_v52, 0.0 }
 0x33d   : > { %v1029_v24 = vmul.f32 %v1998_v29, %v1028_v6  ;;  %v1021_v19 = vmul.f32 %v1020_v36, %v2770_v17  ;;  %v1328_v28 = vmul.f32 %v1295_v25, %v1295_v25  ;;  %vm1046_vm2 = vcmp.eq.f32.partialorder %v2830_v4, inf }
 0x33e   : > { %vm1048_vm3 = vcmp.eq.f32.partialorder %v2830_v4, 0.0 }
 0x33f   : > { %v1030_v0 = vmul.f32 0.5, %v1029_v24  ;;  %v1296_v24 = vmax.f32 %v1791_v34, 0.0  ;;  %v1023_v48 = vsel %vm1022_vm14, %v2770_v17, %v1021_v19  ;;  %v1360_v46 = vmul.f32 %v1328_v28, %v2682_v39 }
 0x340   : > { %v1026_v33 = vsel %vm1024_vm15, %v1025_v55, %v1023_v48  ;;  %v1330_v34 = vmul.f32 %v1297_v35, %v1297_v35  ;;  %v1373_v35 = vmul.f32 %v1341_v63, %v2462_v50 }
 0x341   : > { %v1031_v2 = vsub.f32 1.5, %v1030_v0  ;;  %v1398_v0 = vsel %vm1384_vm4, %v1359_v31, 0.0  ;;  %v1794_v19 = vadd.f32 -1.0, %v1026_v33  ;;  %v1049_v31 = vand.u32 2147483648, %v2830_v4 }
 0x342   : > { %v2000_v21 = vpop.eup %1999  ;;  %v1399_v15 = vadd.f32 %v1398_v0, %v1397_v40 }
 0x343   : > { %v1032_v61 = vmul.f32 %v1998_v29, %v1031_v2  ;;  %v1040_v9 = vmul.f32 %v2000_v21, %v2830_v4  ;;  %v2863_v6 = vpop.xlane.xlu1 %821  ;;  %v1014_v29 = vsel %vm1012_vm13, %v1013_v38, %v1011_v14  ;;  %v1329_v2 = vmul.f32 %v1296_v24, %v1296_v24 }
 0x344   : > { %2001 = vrsqrt.f32 %v2863_v6  ;;  %v1793_v42 = vadd.f32 -1.0, %v1014_v29  ;;  %v1299_v28 = vmax.f32 %v1794_v19, 0.0  ;;  %v2904_v29 = vsel %vm1384_vm4, %v2809_v7, 0.0 }
 0x345   : > { %v1041_v37 = vmul.f32 %v2000_v21, %v1040_v9  ;;  %v1033_v45 = vmul.f32 %v1032_v61, %v2797_v43  ;;  %v1361_v52 = vmul.f32 %v1329_v2, %v2716_v51  ;;  %v656_v51 = vpop.f32.mrf.mxu1  ;;  %vm1058_vm6 = vcmp.eq.f32.partialorder %v2863_v6, inf }
 0x346   : > { %v1298_v39 = vmax.f32 %v1793_v42, 0.0  ;;  %v1342_v42 = vmul.f32 %v1309_v13, %v1309_v13  ;;  %vm1060_vm7 = vcmp.eq.f32.partialorder %v2863_v6, 0.0 }
 0x347   : > { %v1042_v36 = vmul.f32 0.5, %v1041_v37  ;;  %v1035_v5 = vsel %vm1034_vm0, %v2797_v43, %v1033_v45  ;;  %v1362_v37 = vmul.f32 %v1330_v34, %v2761_v26  ;;  %v1402_v26 = vsel %vm1384_vm4, %v1361_v52, 0.0 }
 0x348   : > { %v1038_v9 = vsel %vm1036_vm1, %v1037_v59, %v1035_v5  ;;  %v1331_v48 = vmul.f32 %v1298_v39, %v1298_v39 }
 0x349   : > { %v1043_v20 = vsub.f32 1.5, %v1042_v36  ;;  %v1795_v55 = vadd.f32 -1.0, %v1038_v9  ;;  %v1404_v5 = vsel %vm1384_vm4, %v1362_v37, 0.0 }
 0x34a   : > { %v2002_v30 = vpop.eup %2001  ;;  %v1363_v63 = vmul.f32 %v1331_v48, %v2799_v47 }
 0x34b   : > { %v1044_v57 = vmul.f32 %v2000_v21, %v1043_v20  ;;  %v1052_v60 = vmul.f32 %v2002_v30, %v2863_v6  ;;  %v2887_v17 = vpop.xlane.xlu1 %851  ;;  %v2889_v25 = vpop.xlane.xlu2 %824  ;;  %v1400_v21 = vsel %vm1384_vm4, %v1360_v46, 0.0  ;;  %v1300_v13 = vmax.f32 %v1795_v55, 0.0 }
 0x34c   : > { %2003 = vrsqrt.f32 %v2887_v17  ;;  %v1401_v33 = vadd.f32 %v1400_v21, %v1399_v15  ;;  %v1406_v9 = vsel %vm1384_vm4, %v1363_v63, 0.0  ;;  %v1374_v15 = vmul.f32 %v1342_v42, %v2469_v56 }
 0x34d   : > { %v1045_v14 = vmul.f32 %v1044_v57, %v2830_v4  ;;  %v1053_v61 = vmul.f32 %v2002_v30, %v1052_v60  ;;  %2005 = vrsqrt.f32 %v2889_v25  ;;  %v1332_v57 = vmul.f32 %v1299_v28, %v1299_v28  ;;  %v659_v56 = vpop.f32.mrf.mxu1 }
 0x34e   : > { %v1061_v60 = vand.u32 2147483648, %v2863_v6  ;;  %vm1070_vm9 = vcmp.eq.f32.partialorder %v2889_v25, inf  ;;  %vm1072_vm10 = vcmp.eq.f32.partialorder %v2889_v25, 0.0  ;;  %vm1178_vm11 = vcmp.eq.f32.partialorder %v2887_v17, inf }
 0x34f   : > { %v1047_v38 = vsel %vm1046_vm2, %v2830_v4, %v1045_v14  ;;  %v1054_v43 = vmul.f32 0.5, %v1053_v61  ;;  %v1343_v4 = vmul.f32 %v1310_v18, %v1310_v18  ;;  %v1403_v14 = vadd.f32 %v1402_v26, %v1401_v33 }
 0x350   : > { %v1050_v24 = vsel %vm1048_vm3, %v1049_v31, %v1047_v38  ;;  %v1364_v47 = vmul.f32 %v1332_v57, %v2840_v58  ;;  %v1333_v31 = vmul.f32 %v1300_v13, %v1300_v13  ;;  %v2930_v38 = vsel %vm1384_vm4, %v1373_v35, 0.0 }
 0x351   : > { %v1055_v45 = vsub.f32 1.5, %v1054_v43  ;;  %v1796_v0 = vadd.f32 -1.0, %v1050_v24  ;;  %v1405_v37 = vadd.f32 %v1404_v5, %v1403_v14  ;;  %v1073_v57 = vand.u32 2147483648, %v2889_v25 }
 0x352   : > { %v2906_v36 = vpop.eup %2003  ;;  %vm1180_vm12 = vcmp.eq.f32.partialorder %v2887_v17, 0.0 }
 0x353   : > { %v2006_v40 = vpop.eup %2005  ;;  %v1056_v20 = vmul.f32 %v2002_v30, %v1055_v45  ;;  %v1172_v7 = vmul.f32 %v2906_v36, %v2887_v17  ;;  %v2912_v46 = vpop.xlane.xlu1 %857  ;;  %v1301_v19 = vmax.f32 %v1796_v0, 0.0  ;;  %v1407_v26 = vadd.f32 %v1406_v9, %v1405_v37 }
 0x354   : > { %v2914_v2 = vpop.xlane.xlu2 %848  ;;  %v1064_v50 = vmul.f32 %v2006_v40, %v2889_v25  ;;  %2007 = vrsqrt.f32 %v2912_v46  ;;  %v1408_v0 = vsel %vm1384_vm4, %v1364_v47, 0.0  ;;  %vm1202_vm13 = vcmp.eq.f32.partialorder %v2912_v46, inf }
 0x355   : > { %v1057_v18 = vmul.f32 %v1056_v20, %v2863_v6  ;;  %v1173_v30 = vmul.f32 %v2906_v36, %v1172_v7  ;;  %2009 = vrsqrt.f32 %v2914_v2  ;;  %v1334_v24 = vmul.f32 %v1301_v19, %v1301_v19 }
 0x356   : > { %v1065_v34 = vmul.f32 %v2006_v40, %v1064_v50  ;;  %vm1166_vm14 = vcmp.eq.f32.partialorder %v2914_v2, inf  ;;  %vm1168_vm15 = vcmp.eq.f32.partialorder %v2914_v2, 0.0  ;;  %vm1204_vm0 = vcmp.eq.f32.partialorder %v2912_v46, 0.0 }
 0x357   : > { %v1059_v59 = vsel %vm1058_vm6, %v2863_v6, %v1057_v18  ;;  %v1174_v39 = vmul.f32 0.5, %v1173_v30  ;;  %v1375_v6 = vmul.f32 %v1343_v4, %v2475_v62  ;;  %v1365_v62 = vmul.f32 %v1333_v31, %v2876_v22 }
 0x358   : > { %v1062_v61 = vsel %vm1060_vm7, %v1061_v60, %v1059_v59  ;;  %v1066_v21 = vmul.f32 0.5, %v1065_v34  ;;  %v1366_v50 = vmul.f32 %v1334_v24, %v656_v51  ;;  %v2955_v18 = vsel %vm1384_vm4, %v1374_v15, 0.0 }
 0x359   : > { %v1797_v52 = vadd.f32 -1.0, %v1062_v61  ;;  %v1175_v58 = vsub.f32 1.5, %v1174_v39  ;;  %v2958_v30 = vsel %vm1384_vm4, %v1375_v6, 0.0  ;;  %v1409_v60 = vadd.f32 %v1408_v0, %v1407_v26  ;;  %v662_v0 = vpop.f32.mrf.mxu1 }
 0x35a   : > { %v2932_v43 = vpop.eup %2007  ;;  %v1067_v28 = vsub.f32 1.5, %v1066_v21  ;;  %v1410_v34 = vsel %vm1384_vm4, %v1365_v62, 0.0 }
 0x35b   : > { %v1302_v48 = vmax.f32 %v1797_v52, 0.0  ;;  %v1196_v55 = vmul.f32 %v2932_v43, %v2912_v46  ;;  %v2938_v45 = vpop.xlane.xlu1 %863  ;;  %v2010_v35 = vpop.eup %2009  ;;  %v1411_v52 = vadd.f32 %v1410_v34, %v1409_v60 }
 0x35c   : > { %v2940_v33 = vpop.xlane.xlu2 %854  ;;  %v1068_v20 = vmul.f32 %v2006_v40, %v1067_v28  ;;  %2011 = vrsqrt.f32 %v2938_v45  ;;  %v1160_v4 = vmul.f32 %v2010_v35, %v2914_v2  ;;  %v1176_v40 = vmul.f32 %v2906_v36, %v1175_v58 }
 0x35d   : > { %v1197_v42 = vmul.f32 %v2932_v43, %v1196_v55  ;;  %v1335_v7 = vmul.f32 %v1302_v48, %v1302_v48  ;;  %2013 = vrsqrt.f32 %v2940_v33  ;;  %v1181_v28 = vand.u32 2147483648, %v2887_v17 }
 0x35e   : > { %v1069_v5 = vmul.f32 %v1068_v20, %v2889_v25  ;;  %v1161_v13 = vmul.f32 %v2010_v35, %v1160_v4  ;;  %v1177_v14 = vmul.f32 %v1176_v40, %v2887_v17  ;;  %vm1226_vm1 = vcmp.eq.f32.partialorder %v2938_v45, inf }
 0x35f   : > { %v1198_v63 = vmul.f32 0.5, %v1197_v42  ;;  %v1367_v36 = vmul.f32 %v1335_v7, %v659_v56  ;;  %vm1190_vm2 = vcmp.eq.f32.partialorder %v2940_v33, inf  ;;  %vm1192_vm3 = vcmp.eq.f32.partialorder %v2940_v33, 0.0 }
 0x360   : > { %v1071_v22 = vsel %vm1070_vm9, %v2889_v25, %v1069_v5  ;;  %v1162_v39 = vmul.f32 0.5, %v1161_v13  ;;  %v1412_v25 = vsel %vm1384_vm4, %v1366_v50, 0.0  ;;  %v1179_v20 = vsel %vm1178_vm11, %v2887_v17, %v1177_v14 }
 0x361   : > { %v1074_v51 = vsel %vm1072_vm10, %v1073_v57, %v1071_v22  ;;  %v1199_v47 = vsub.f32 1.5, %v1198_v63  ;;  %v1413_v48 = vadd.f32 %v1412_v25, %v1411_v52  ;;  %v1414_v58 = vsel %vm1384_vm4, %v1367_v36, 0.0 }
 0x362   : > { %v2012_v19 = vpop.eup %2011  ;;  %v1798_v59 = vadd.f32 -1.0, %v1074_v51  ;;  %v1163_v37 = vsub.f32 1.5, %v1162_v39  ;;  %v1182_v40 = vsel %vm1180_vm12, %v1181_v28, %v1179_v20  ;;  %v1169_v13 = vand.u32 2147483648, %v2914_v2 }
 0x363   : > { %v1220_v61 = vmul.f32 %v2012_v19, %v2938_v45  ;;  %v2966_v21 = vpop.xlane.xlu1 %869  ;;  %v2014_v31 = vpop.eup %2013  ;;  %v1200_v56 = vmul.f32 %v2932_v43, %v1199_v47  ;;  %v1415_v5 = vadd.f32 %v1414_v58, %v1413_v48  ;;  %v1807_v14 = vadd.f32 -1.0, %v1182_v40 }
 0x364   : > { %v2968_v9 = vpop.xlane.xlu2 %860  ;;  %v1303_v15 = vmax.f32 %v1798_v59, 0.0  ;;  %2015 = vrsqrt.f32 %v2966_v21  ;;  %v1184_v24 = vmul.f32 %v2014_v31, %v2940_v33  ;;  %v1164_v26 = vmul.f32 %v2010_v35, %v1163_v37 }
 0x365   : > { %v1221_v6 = vmul.f32 %v2012_v19, %v1220_v61  ;;  %2017 = vrsqrt.f32 %v2968_v9  ;;  %v1201_v34 = vmul.f32 %v1200_v56, %v2912_v46  ;;  %v1312_v58 = vmax.f32 %v1807_v14, 0.0 }
 0x366   : > { %v1336_v55 = vmul.f32 %v1303_v15, %v1303_v15  ;;  %v1185_v42 = vmul.f32 %v2014_v31, %v1184_v24  ;;  %v1165_v7 = vmul.f32 %v1164_v26, %v2914_v2  ;;  %v1193_v24 = vand.u32 2147483648, %v2940_v33 }
 0x367   : > { %v1222_v62 = vmul.f32 0.5, %v1221_v6  ;;  %vm1228_vm6 = vcmp.eq.f32.partialorder %v2938_v45, 0.0  ;;  %vm1214_vm7 = vcmp.eq.f32.partialorder %v2968_v9, inf  ;;  %vm1216_vm9 = vcmp.eq.f32.partialorder %v2968_v9, 0.0 }
 0x368   : > { %v1368_v4 = vmul.f32 %v1336_v55, %v662_v0  ;;  %v1186_v57 = vmul.f32 0.5, %v1185_v42  ;;  %v1167_v63 = vsel %vm1166_vm14, %v2914_v2, %v1165_v7  ;;  %v1205_v2 = vand.u32 2147483648, %v2912_v46 }
 0x369   : > { %v1223_v35 = vsub.f32 1.5, %v1222_v62  ;;  %v1170_v39 = vsel %vm1168_vm15, %v1169_v13, %v1167_v63  ;;  %vm1250_vm10 = vcmp.eq.f32.partialorder %v2966_v21, inf  ;;  %vm1252_vm12 = vcmp.eq.f32.partialorder %v2966_v21, 0.0 }
 0x36a   : > { %v2016_v50 = vpop.eup %2015  ;;  %v1416_v43 = vsel %vm1384_vm4, %v1368_v4, 0.0  ;;  %v1187_v36 = vsub.f32 1.5, %v1186_v57  ;;  %v1806_v37 = vadd.f32 -1.0, %v1170_v39  ;;  %v1253_v39 = vand.u32 2147483648, %v2966_v21 }
 0x36b   : > { %v2018_v22 = vpop.eup %2017  ;;  %v1417_v60 = vadd.f32 %v1416_v43, %v1415_v5  ;;  %v1224_v51 = vmul.f32 %v2012_v19, %v1223_v35  ;;  %v1244_v17 = vmul.f32 %v2016_v50, %v2966_v21  ;;  %v1229_v19 = vand.u32 2147483648, %v2938_v45 }
 0x36c   : > { %v2990_v59 = vpop.xlane.xlu2 %866  ;;  %v1208_v25 = vmul.f32 %v2018_v22, %v2968_v9  ;;  %v1188_v61 = vmul.f32 %v2014_v31, %v1187_v36  ;;  %v1311_v62 = vmax.f32 %v1806_v37, 0.0  ;;  %v1217_v43 = vand.u32 2147483648, %v2968_v9 }
 0x36d   : > { %2019 = vrsqrt.f32 %v2990_v59  ;;  %v1419_v47 = vadd.f32 %v2750_v54, %v1417_v60  ;;  %v1245_v52 = vmul.f32 %v2016_v50, %v1244_v17  ;;  %v1225_v28 = vmul.f32 %v1224_v51, %v2938_v45 }
 0x36e   : > { %v1209_v15 = vmul.f32 %v2018_v22, %v1208_v25  ;;  %v1189_v6 = vmul.f32 %v1188_v61, %v2940_v33  ;;  %v1203_v54 = vsel %vm1202_vm13, %v2912_v46, %v1201_v34  ;;  %v1344_v36 = vmul.f32 %v1311_v62, %v1311_v62 }
 0x36f   : > { %v1246_v31 = vmul.f32 0.5, %v1245_v52  ;;  %v1206_v7 = vsel %vm1204_vm0, %v1205_v2, %v1203_v54  ;;  %v1421_v13 = vadd.f32 %v2757_v1, %v1419_v47  ;;  %vm1238_vm11 = vcmp.eq.f32.partialorder %v2990_v59, inf }
 0x370   : > { %v1210_v48 = vmul.f32 0.5, %v1209_v15  ;;  %v1191_v55 = vsel %vm1190_vm2, %v2940_v33, %v1189_v6  ;;  %v1227_v33 = vsel %vm1226_vm1, %v2938_v45, %v1225_v28  ;;  %v1809_v51 = vadd.f32 -1.0, %v1206_v7 }
 0x371   : > { %v1194_v20 = vsel %vm1192_vm3, %v1193_v24, %v1191_v55  ;;  %v1247_v56 = vsub.f32 1.5, %v1246_v31  ;;  %v1345_v52 = vmul.f32 %v1312_v58, %v1312_v58  ;;  %vm1240_vm13 = vcmp.eq.f32.partialorder %v2990_v59, 0.0 }
 0x372   : > { %v1211_v0 = vsub.f32 1.5, %v1210_v48  ;;  %v1808_v40 = vadd.f32 -1.0, %v1194_v20  ;;  %v1314_v61 = vmax.f32 %v1809_v51, 0.0  ;;  %v1376_v54 = vmul.f32 %v1344_v36, %v2480_v16 }
 0x373   : > { %v2020_v26 = vpop.eup %2019  ;;  %v1248_v57 = vmul.f32 %v2016_v50, %v1247_v56  ;;  %v1423_v50 = vadd.f32 %v2787_v41, %v1421_v13  ;;  %vm1469_vm0 = vcmask 3072  }
 0x374   : > { %v1232_v42 = vmul.f32 %v2020_v26, %v2990_v59  ;;  %v3011_v4 = vpop.xlane.xlu2 %1513  ;;  %v1212_v5 = vmul.f32 %v2018_v22, %v1211_v0  ;;  %v1313_v17 = vmax.f32 %v1808_v40, 0.0  ;;  %v1347_v31 = vmul.f32 %v1314_v61, %v1314_v61 }
 0x375   : > { %v1534_v35 = vadd.f32 %v2789_v53, %v3011_v4  ;;  %v1249_v34 = vmul.f32 %v1248_v57, %v2966_v21  ;;  %v1230_v53 = vsel %vm1228_vm6, %v1229_v19, %v1227_v33  ;;  %v1425_v41 = vadd.f32 %v2904_v29, %v1423_v50 }
 0x376   : > { %v1233_v63 = vmul.f32 %v2020_v26, %v1232_v42  ;;  %v1213_v46 = vmul.f32 %v1212_v5, %v2968_v9  ;;  %v1811_v2 = vadd.f32 -1.0, %v1230_v53  ;;  %v1346_v6 = vmul.f32 %v1313_v17, %v1313_v17 }
 0x377   : > { %v1536_v60 = vsub.f32 %v1534_v35, %v2753_v10  ;;  %v1251_v45 = vsel %vm1250_vm10, %v2966_v21, %v1249_v34  ;;  %v1241_v29 = vand.u32 2147483648, %v2990_v59  ;;  %v1432_v56 = vsel %vm1384_vm4, %v1376_v54, 0.0 }
 0x378   : > { %v1234_v22 = vmul.f32 0.5, %v1233_v63  ;;  %v1215_v1 = vsel %vm1214_vm7, %v2968_v9, %v1213_v46  ;;  %v1254_v15 = vsel %vm1252_vm12, %v1253_v39, %v1251_v45  ;;  %v1427_v9 = vadd.f32 %v2930_v38, %v1425_v41 }
 0x379   : > { %v3034_v25 = vmax.f32 %v1536_v60, 0.0  ;;  %v1218_v14 = vsel %vm1216_vm9, %v1217_v43, %v1215_v1  ;;  %v1316_v24 = vmax.f32 %v1811_v2, 0.0  ;;  %v1813_v58 = vadd.f32 -1.0, %v1254_v15 }
 0x37a   : > { %v1235_v10 = vsub.f32 1.5, %v1234_v22  ;;  %v1810_v47 = vadd.f32 -1.0, %v1218_v14  ;;  %v1429_v21 = vadd.f32 %v2955_v18, %v1427_v9  ;;  %v1378_v20 = vmul.f32 %v1346_v6, %v2490_v49 }
 0x37b   : > { %2021 = vrsqrt.f32 %v3034_v25  ;;  %v1349_v62 = vmul.f32 %v1316_v24, %v1316_v24  ;;  %v1379_v18 = vmul.f32 %v1347_v31, %v2496_v3  ;;  %v1318_v5 = vmax.f32 %v1813_v58, 0.0 }
 0x37c   : > { %v1236_v19 = vmul.f32 %v2020_v26, %v1235_v10  ;;  %v1315_v37 = vmax.f32 %v1810_v47, 0.0  ;;  %v1377_v26 = vmul.f32 %v1345_v52, %v2485_v44  ;;  %v1431_v0 = vadd.f32 %v2958_v30, %v1429_v21 }
 0x37d   : > { %2023 = vrsqrt.f32 %v3011_v4  ;;  %v1436_v49 = vsel %vm1384_vm4, %v1378_v20, 0.0  ;;  %v1381_v40 = vmul.f32 %v1349_v62, %v2517_v23  ;;  %v1351_v13 = vmul.f32 %v1318_v5, %v1318_v5 }
 0x37e   : > { %v1237_v28 = vmul.f32 %v1236_v19, %v2990_v59  ;;  %v1348_v55 = vmul.f32 %v1315_v37, %v1315_v37  ;;  %v1433_v42 = vadd.f32 %v1432_v56, %v1431_v0  ;;  %v1438_v46 = vsel %vm1384_vm4, %v1379_v18, 0.0 }
 0x37f   : > { %v1383_v1 = vmul.f32 %v1351_v13, %v2553_v8  ;;  %v1442_v23 = vsel %vm1384_vm4, %v1381_v40, 0.0  ;;  %vm1545_vm14 = vcmp.eq.f32.partialorder %v3034_v25, inf  ;;  %v1548_v15 = vand.u32 2147483648, %v3034_v25 }
 0x380   : > { %v1239_v48 = vsel %vm1238_vm11, %v2990_v59, %v1237_v28  ;;  %v1380_v44 = vmul.f32 %v1348_v55, %v2507_v12  ;;  %v1434_v59 = vsel %vm1384_vm4, %v1377_v26, 0.0  ;;  %vm1547_vm15 = vcmp.eq.f32.partialorder %v3034_v25, 0.0 }
 0x381   : > { %v1242_v38 = vsel %vm1240_vm13, %v1241_v29, %v1239_v48  ;;  %v2022_v7 = vpop.eup %2021  ;;  %v1435_v35 = vadd.f32 %v1434_v59, %v1433_v42  ;;  %v1446_v61 = vsel %vm1384_vm4, %v1383_v1, 0.0  ;;  %v1470_v24 = vsel %vm1469_vm0, %v2690_v11, 0.0 }
 0x382   : > { %v1812_v16 = vadd.f32 -1.0, %v1242_v38  ;;  %v1539_v30 = vmul.f32 %v2022_v7, %v3034_v25  ;;  %v1440_v60 = vsel %vm1384_vm4, %v1380_v44, 0.0  ;;  %v1551_v31 = vsub.f32 1.0, %v2577_v32 }
 0x383   : > { %v1437_v43 = vadd.f32 %v1436_v49, %v1435_v35  ;;  %v2024_v12 = vpop.eup %2023  ;;  %vm1597_vm1 = vcmp.eq.f32.partialorder %v3011_v4, 0.0 }
 0x384   : > { %v1317_v33 = vmax.f32 %v1812_v16, 0.0  ;;  %v1540_v63 = vmul.f32 %v2022_v7, %v1539_v30  ;;  %v1524_v22 = vpop.permute.xlu1 %1523  ;;  %v1589_v10 = vmul.f32 %v2024_v12, %v3011_v4 }
 0x385   : > { %v1439_v34 = vadd.f32 %v1438_v46, %v1437_v43  ;;  %v1526_v36 = vmul.f32 %v2577_v32, %v1524_v22  ;;  %v1598_v32 = vand.u32 2147483648, %v3011_v4 }
 0x386   : > { %v1350_v57 = vmul.f32 %v1317_v33, %v1317_v33  ;;  %v1541_v51 = vmul.f32 0.5, %v1540_v63  ;;  %v1590_v52 = vmul.f32 %v2024_v12, %v1589_v10 }
 0x387   : > { %v1441_v53 = vadd.f32 %v1440_v60, %v1439_v34  ;;  %v1527_v14 = vsel %vm1511_vm5, %v1526_v36, 0.0 }
 0x388   : > { %v1382_v3 = vmul.f32 %v1350_v57, %v2531_v27  ;;  %v1542_v50 = vsub.f32 1.5, %v1541_v51  ;;  %v1528_v45 = vrot.slane %v1527_v14, 4  ;;  %v1591_v6 = vmul.f32 0.5, %v1590_v52 }
 0x389   : > { %v1443_v17 = vadd.f32 %v1442_v23, %v1441_v53 }
 0x38a   : > { %v1444_v39 = vsel %vm1384_vm4, %v1382_v3, 0.0  ;;  %v1543_v27 = vmul.f32 %v2022_v7, %v1542_v50  ;;  %v1529_v41 = vadd.f32 %v1528_v45, %v1527_v14  ;;  %v1592_v48 = vsub.f32 1.5, %v1591_v6 }
 0x38b   : > { %v1445_v47 = vadd.f32 %v1444_v39, %v1443_v17  ;;  %vm1595_vm4 = vcmp.eq.f32.partialorder %v3011_v4, inf  ;;  %v1319_v39 = vld [vmem:[#allocation4] sm:$0x1] }
 0x38c   : > { %v1544_v2 = vmul.f32 %v1543_v27, %v3034_v25  ;;  %v1530_v37 = vrot.slane %v1529_v41, 2  ;;  %v1593_v38 = vmul.f32 %v2024_v12, %v1592_v48 }
 0x38d   : > { %v1447_v8 = vadd.f32 %v1446_v61, %v1445_v47 }
 0x38e   : > { %v1546_v19 = vsel %vm1545_vm14, %v3034_v25, %v1544_v2  ;;  %v1531_v28 = vadd.f32 %v1530_v37, %v1529_v41  ;;  %v1594_v16 = vmul.f32 %v1593_v38, %v3011_v4 }
 0x38f   : > { %1448 = vadd.xlane.f32.xlu2 %v1447_v8  ;;  %v1549_v9 = vsel %vm1547_vm15, %v1548_v15, %v1546_v19 }
 0x390   : > { %v1532_v54 = vrot.slane %v1531_v28, 1  ;;  %v1553_v29 = vsub.f32 3.0, %v1549_v9  ;;  %v1596_v11 = vsel %vm1595_vm4, %v3011_v4, %v1594_v16 }
 0x391   : > { %v1599_v56 = vsel %vm1597_vm1, %v1598_v32, %v1596_v11 }
 0x392   : > { %v1533_v21 = vadd.f32 %v1532_v54, %v1531_v28  ;;  %v1554_v55 = vmax.f32 %v1553_v29, 0.0  ;;  %v1600_v62 = vsel %vm1469_vm0, %v1599_v56, 0.0 }
 0x394   : > { %v1550_v58 = vmul.f32 %v1533_v21, %v1524_v22 }
 0x396   : > { %v1552_v26 = vmul.f32 %v1551_v31, %v1550_v58 }
 0x397   : > { %1471 = vadd.xlane.f32.xlu2 %v1470_v24 }
 0x398   : > { %v1555_v0 = vmul.f32 %v1554_v55, %v1552_v26 }
 0x39a   : > { %v1556_v25 = vmul.f32 %v1555_v0, %v1555_v0 }
 0x39c   : > { %v1557_v20 = vsel %vm1511_vm5, %v1556_v25, 0.0 }
 0x39f   : > { %1558 = vadd.xlane.f32.xlu2 %v1557_v20 }
 0x3a7   : > { %1601 = vadd.xlane.f32.xlu2 %v1600_v62 }
 0x402   : > { %v1449_v18 = vpop.xlane.xlu2 %1448 }
 0x403   : > { %v1450_v42 = vrot.slane %v1449_v18, 4 }
 0x405   : > { %v1451_v7 = vadd.f32 %v1450_v42, %v1449_v18 }
 0x407   : > { %v1452_v33 = vrot.slane %v1451_v7, 2 }
 0x409   : > { %v1453_v5 = vadd.f32 %v1452_v33, %v1451_v7 }
 0x40a   : > { %v1472_v44 = vpop.xlane.xlu2 %1471 }
 0x40b   : > { %v1473_v59 = vrot.slane %v1472_v44, 4  ;;  %v1454_v35 = vrot.slane %v1453_v5, 1 }
 0x40d   : > { %v1474_v30 = vadd.f32 %v1473_v59, %v1472_v44  ;;  %v1455_v57 = vadd.f32 %v1454_v35, %v1453_v5 }
 0x40f   : > { %v1475_v49 = vrot.slane %v1474_v30, 2  ;;  %1825 = vpush %v1455_v57 }
 0x411   : > { %v1476_v40 = vadd.f32 %v1475_v49, %v1474_v30 }
 0x412   : > { %v1559_v43 = vpop.xlane.xlu2 %1558 }
 0x413   : > { %v1477_v63 = vrot.slane %v1476_v40, 1  ;;  %v1560_v4 = vrot.slane %v1559_v43, 4 }
 0x415   : > { %v1478_v13 = vadd.f32 %v1477_v63, %v1476_v40  ;;  %v1561_v3 = vadd.f32 %v1560_v4, %v1559_v43 }
 0x417   : > { %1827 = vpush %v1478_v13  ;;  %v1562_v46 = vrot.slane %v1561_v3, 2 }
 0x419   : > { %v1563_v60 = vadd.f32 %v1562_v46, %v1561_v3 }
 0x41a   : > { %v1602_v12 = vpop.xlane.xlu2 %1601 }
 0x41b   : > { %v1603_v34 = vrot.slane %v1602_v12, 4  ;;  %v1564_v51 = vrot.slane %v1563_v60, 1 }
 0x41d   : > { %v1604_v22 = vadd.f32 %v1603_v34, %v1602_v12  ;;  %v1565_v53 = vadd.f32 %v1564_v51, %v1563_v60 }
 0x41f   : > { %v1605_v50 = vrot.slane %v1604_v22, 2  ;;  %1829 = vpush %v1565_v53 }
 0x421   : > { %v1606_v36 = vadd.f32 %v1605_v50, %v1604_v22 }
 0x423   : > { %v1607_v1 = vrot.slane %v1606_v36, 1 }
 0x425   : > { %v1608_v23 = vadd.f32 %v1607_v1, %v1606_v36 }
 0x427   : > { %1831 = vpush %v1608_v23 }
 0x440   : > { %s1826_s9 = spop %1825 }
 0x441   : > { %v1457_v17 = vstv %s1826_s9 }
 0x442   : > { %v1458_v27 = vadd.f32 %v1457_v17, %v1319_v39 }
 0x444   : > { %1460 = vst.msk [vmem:[#allocation4] sm:$0x1] %vm312_vm8, %v1458_v27 }
 0x448   : > { %s1828_s6 = spop %1827 }
 0x449   : > { %v1480_v10 = vstv %s1828_s6 }
 0x44a   : > { %v1481_v14 = vmax.f32 %v1480_v10, 1.0  ;;  %v1818_v45 = vadd.f32 -1.0, %v1480_v10 }
 0x44b   : > { %v1626_v11 = vld [vmem:[#allocation4] sm:$0x1] }
 0x44c   : > { %v1569_v47 = vmul.f32 %v1818_v45, %v1480_v10  ;;  %2025 = vrcp.f32 %v1481_v14  ;;  %v1622_v52 = vand.u32 2147483648, %v1481_v14  ;;  %v1620_v9 = vand.u32 2147483647, %v1481_v14 }
 0x44d   : > { %vm1616_vm2 = vweird.f32 %v1481_v14 }
 0x44e   : > { %v1571_v2 = vmax.f32 %v1569_v47, 1.0  ;;  %v1623_v29 = vor.u32 1.1754944e-38, %v1622_v52  ;;  %vm1621_vm7 = vcmp.eq.f32.partialorder %v1620_v9, 8.507059e+37  ;;  %vm1570_vm12 = vcmp.gt.f32.partialorder %v1569_v47, 0.5 }
 0x450   : > { %2027 = vrcp.f32 %v1571_v2  ;;  %v1583_v54 = vand.u32 2147483648, %v1571_v2  ;;  %s1830_s7 = spop %1829  ;;  %v1581_v31 = vand.u32 2147483647, %v1571_v2  ;;  %vm1577_vm9 = vweird.f32 %v1571_v2 }
 0x451   : > { %v1567_v0 = vstv %s1830_s7 }
 0x452   : > { %v2026_v61 = vpop.eup %2025  ;;  %v1584_v55 = vor.u32 1.1754944e-38, %v1583_v54  ;;  %vm1582_vm11 = vcmp.eq.f32.partialorder %v1581_v31, 8.507059e+37 }
 0x453   : > { %v1612_v41 = vmul.f32 %v2026_v61, %v1481_v14  ;;  %vm1617_vm5 = vweird.f32 %v2026_v61 }
 0x454   : > { %vm1618_vm3 = vmor %vm1616_vm2, %vm1617_vm5 }
 0x455   : > { %v1613_v8 = vsub.f32 1.0, %v1612_v41 }
 0x456   : > { %v2028_v19 = vpop.eup %2027 }
 0x457   : > { %v1573_v15 = vmul.f32 %v2028_v19, %v1571_v2  ;;  %v1614_v37 = vmul.f32 %v2026_v61, %v1613_v8  ;;  %vm1578_vm6 = vweird.f32 %v2028_v19 }
 0x458   : > { %s1832_s8 = spop %1831  ;;  %vm1579_vm10 = vmor %vm1577_vm9, %vm1578_vm6 }
 0x459   : > { %v1574_v28 = vsub.f32 1.0, %v1573_v15  ;;  %v1615_v6 = vadd.f32 %v2026_v61, %v1614_v37  ;;  %v1610_v38 = vstv %s1832_s8 }
 0x45b   : > { %v1575_v24 = vmul.f32 %v2028_v19, %v1574_v28  ;;  %v1619_v21 = vsel %vm1618_vm3, %v2026_v61, %v1615_v6 }
 0x45c   : > { %v1624_v58 = vsel %vm1621_vm7, %v1623_v29, %v1619_v21 }
 0x45d   : > { %v1576_v48 = vadd.f32 %v2028_v19, %v1575_v24  ;;  %v1625_v16 = vmul.f32 %v1624_v58, %v1610_v38  ;;  %v1627_v32 = vmul.f32 %v1626_v11, %v1624_v58 }
 0x45f   : > { %v1580_v26 = vsel %vm1579_vm10, %v2028_v19, %v1576_v48  ;;  %v1629_v18 = vmul.f32 0.001, %v1625_v16 }
 0x460   : > { %v1585_v25 = vsel %vm1582_vm11, %v1584_v55, %v1580_v26 }
 0x461   : > { %v1586_v20 = vmul.f32 %v1585_v25, %v1567_v0 }
 0x463   : > { %v1587_v56 = vsel %vm1570_vm12, %v1586_v20, 0.0 }
 0x464   : > { %v1628_v62 = vadd.f32 %v1627_v32, %v1587_v56 }
 0x466   : > { %v1630_v42 = vadd.f32 %v1629_v18, %v1628_v62 }
 0x468   : > { %1631 = vst.msk [vmem:[#allocation5] sm:$0x1] %vm312_vm8, %v1630_v42 }
 0x469 PF: > { %p1837_p6 = scmp.eq.s32.totalorder %s1704_s12, 1  ;;  %s1640_s16 = sshll.u32 %s3106_s2, 4  ;;  %s1641_s16 = int_to_ptr.hbm [resolvable:$true] %s1640_s16 }
 0x46a   : > { %s2091_s17 = smov [#allocation5]  }
 0x46b   : > { %s1638_s18 = sshll.u32 %s2091_s17, 4  ;;  %s1639_s18 = int_to_ptr.vmem [resolvable:$true] %s1638_s18 }
 0x46c   : > { %1834 = dma.vmem_to_hbm [thread:$0]  (%p1837_p6), %s1639_s18, 16, %s1641_s16, [#allocation6]  }
 0x46d   : > { %2070 = dma.done.wait (%p1837_p6), [#allocation6], 16  }
 0x46e   : > { %2072 = vsyncadd (%p1837_p6), [#allocation6], 4294967280 }
 0x46f PF: > { %s13_s11 = sadd.s32 1, %s2083_s11   ;;  %s3111_s9 = smov %s2079_s10 }
 0x470   : > { %p10_p7 = scmp.ge.s32.totalorder %s13_s11, 4   ;;  %s3112_s10 = smov %s3114_s13 }
 0x472   :  { %12 = sbr.rel (!%p10_p7) target bundleno = 2 (0x2), region = 82 }
 0x477   :  { %1654 = vsyncpa [#allocation6], 1 }
 0x478   :  { %1656 = vsyncpa [#allocation6 + $0x1], 1 }

</bundles_post_ra>
